<compile_context>
chip_gen: v7x
topology: tpu7x:2x2x1
jax: 0.10.0
libtpu: 0.0.40
codegen_flags: <defaults>
</compile_context>

<pallas_src>
import functools

import jax
import jax.numpy as jnp
from jax import lax
from jax.experimental import pallas as pl
from jax.experimental.pallas import tpu as pltpu


def heade_kernel(x_ref, mask_ref, w1_ref, shift_ref, w2t_ref, b2_ref, o_ref,
                 *, img_w, lane_tile, num_lane_tiles):
    """One (batch n, spatial tile t) step.

    x_ref    : (Cin, L)        bf16  height-padded, row-flattened image (+1 pad each end)
    mask_ref : (2, TL)         bf16  row 0: zero at image col 0, row 1: zero at col W-1
    w1_ref   : (9, Cmid, Cin)  bf16  3x3 weights with BN scale folded in
    shift_ref: (Cmid, 1)       f32   folded BN shift (conv1 bias included)
    w2t_ref  : (De, Cmid)      bf16  transposed 1x1 conv weights
    b2_ref   : (De, 1)         f32   conv2 bias
    o_ref    : (De, TL)              output tile (NCHW-flat spatial on lanes)
    """
    if num_lane_tiles == 1:
        q0 = 0                                   # static slices on this path
    else:
        q0 = pl.multiple_of(pl.program_id(1) * lane_tile, lane_tile)

    mask_l = mask_ref[0:1, :]                    # (1, TL)
    mask_r = mask_ref[1:2, :]                    # (1, TL)

    acc = None
    for dh in range(3):
        for dw in range(3):
            # Tap (dh, dw) of the 3x3 window for output q = h*W + w lives at
            # flat offset q + dh*W + dw of the height-padded image (see
            # wrapper); dw==0 / dw==2 taps wrap across a row edge at the
            # first / last image column and are zeroed by the masks.
            tap = x_ref[:, pl.ds(q0 + dh * img_w + dw, lane_tile)]   # (Cin, TL) bf16
            if dw == 0:
                tap = tap * mask_l
            elif dw == 2:
                tap = tap * mask_r
            part = jnp.dot(w1_ref[dh * 3 + dw], tap,
                           preferred_element_type=jnp.float32)        # (Cmid, TL) f32
            acc = part if acc is None else acc + part

    acc = acc + shift_ref[...]                    # BatchNorm (+ conv1 bias), f32
    acc = jnp.maximum(acc, 0.0)                   # ReLU
    out = jnp.dot(w2t_ref[...], acc.astype(w2t_ref.dtype),
                  preferred_element_type=jnp.float32)                  # (De, TL)
    out = out + b2_ref[...]
    o_ref[...] = out.astype(o_ref.dtype)


def _vmem_bytes(lane_tile, n_cin, n_cmid, n_de, flat_len):
    """Rough per-step VMEM estimate (buffers + live intermediates)."""
    inp = 2 * n_cin * flat_len * 2                                    # whole image, bf16, 2 bufs
    wts = 2 * (9 * n_cmid * n_cin * 2 + n_cmid * 4 + n_de * n_cmid * 2 + n_de * 4)
    msk = 2 * 2 * lane_tile * 2
    out = 2 * n_de * lane_tile * 4
    mid = (n_cmid * 4 + n_de * 4 + 2 * n_cin * 2) * lane_tile         # f32 acc/out + live taps
    return inp + wts + msk + out + mid


def _pick_lane_tile(hw, n_batch, n_cin, n_cmid, n_de, flat_len, budget):
    """Largest divisor of hw that is a multiple of 128 (or hw itself) and fits
    the VMEM budget, preferring >=2 total grid steps (v7x has 2 TensorCores)."""
    cands = [hw // m for m in range(1, min(hw, 512) + 1)
             if hw % m == 0 and (m == 1 or (hw // m) % 128 == 0)]     # descending
    fitting = [tl for tl in cands
               if _vmem_bytes(tl, n_cin, n_cmid, n_de, flat_len) <= budget]
    if not fitting:
        # Whole-image residency already exceeds the budget even at the
        # smallest tile.
        # TODO(synk): switch to manual row-halo DMA (pl.ANY + make_async_copy)
        # for images too large to keep resident in VMEM.
        fitting = [cands[-1]]
    multi = [tl for tl in fitting if n_batch * (hw // tl) >= 2]
    return (multi or fitting)[0]


def heade_forward(x_nchw, params, *, lane_tile=None, out_dtype=None):
    """HeadE forward, NCHW in / NCHW out (eval-mode BatchNorm)."""
    w1, b1, gamma, beta, rmean, rvar, w2, b2 = params
    N, Cin, H, W = x_nchw.shape
    Cmid = w1.shape[-1]
    De = w2.shape[-1]
    eps = 1e-5
    HW = H * W
    L = (H + 2) * W + 2
    out_dtype = out_dtype or x_nchw.dtype      # pass jnp.bfloat16 to halve write-back

    # ---- fold BN (eval) + conv1 bias into conv1 weights / a per-channel shift ----
    # TODO(synk): training-mode BN (batch statistics) is not implemented.
    scale = gamma / jnp.sqrt(rvar + eps)                              # (Cmid,)
    shift = (beta + (b1 - rmean) * scale).astype(jnp.float32).reshape(Cmid, 1)
    w1s = (w1 * scale[None, None, None, :]).reshape(9, Cin, Cmid)     # (9, Cin, Cmid)
    w1s = jnp.transpose(w1s, (0, 2, 1)).astype(jnp.bfloat16)          # (9, Cmid, Cin)
    w2t = jnp.transpose(w2).astype(jnp.bfloat16)                      # (De, Cmid)
    b2c = b2.astype(jnp.float32).reshape(De, 1)

    # ---- input prep: ONE bf16 pass (cast before pad), height padding only ----
    # Flat layout: (row r, col c) of the H-padded image sits at index r*W+c+1,
    # so tap (dh, dw) for output q = h*W + w sits at q + dh*W + dw.  The two
    # taps that would wrap across a row edge are zeroed with the column masks.
    xb = x_nchw.astype(jnp.bfloat16)
    xp = jnp.pad(xb, ((0, 0), (0, 0), (1, 1), (0, 0)))                # (N, Cin, H+2, W)
    xf = jnp.pad(xp.reshape(N, Cin, (H + 2) * W),
                 ((0, 0), (0, 0), (1, 1)))                            # (N, Cin, L)

    col = jnp.arange(HW, dtype=jnp.int32) % W
    masks = jnp.stack([col != 0, col != (W - 1)]).astype(jnp.bfloat16)  # (2, HW)

    # ---- VMEM-budgeted lane tile over the flattened spatial axis ----
    budget = 24 * 1024 * 1024
    if lane_tile is None:
        lane_tile = _pick_lane_tile(HW, N, Cin, Cmid, De, L, budget)
    assert HW % lane_tile == 0 and (lane_tile == HW or lane_tile % 128 == 0)
    n_tiles = HW // lane_tile
    need = _vmem_bytes(lane_tile, Cin, Cmid, De, L)
    vmem_limit = int(min(max(32 * 1024 * 1024, need + (8 << 20)), 100 * 1024 * 1024))

    kern = functools.partial(heade_kernel, img_w=W, lane_tile=lane_tile,
                             num_lane_tiles=n_tiles)

    def build(single_buffer_weights):
        # Constant-index weight/bias blocks never change across the grid;
        # single-buffering them halves their VMEM footprint.
        kw = dict(pipeline_mode=pl.Buffered(1)) if single_buffer_weights else {}
        in_specs = [
            pl.BlockSpec((None, Cin, L), lambda n, t: (n, 0, 0)),
            pl.BlockSpec((2, lane_tile), lambda n, t: (0, t)),
            pl.BlockSpec((9, Cmid, Cin), lambda n, t: (0, 0, 0), **kw),
            pl.BlockSpec((Cmid, 1), lambda n, t: (0, 0), **kw),
            pl.BlockSpec((De, Cmid), lambda n, t: (0, 0), **kw),
            pl.BlockSpec((De, 1), lambda n, t: (0, 0), **kw),
        ]
        return pl.pallas_call(
            kern,
            out_shape=jax.ShapeDtypeStruct((N, De, HW), out_dtype),
            grid=(N, n_tiles),
            in_specs=in_specs,
            out_specs=pl.BlockSpec((None, De, lane_tile), lambda n, t: (n, 0, t)),
            compiler_params=pltpu.CompilerParams(
                dimension_semantics=("parallel", "parallel"),
                vmem_limit_bytes=vmem_limit),
        )

    args = (xf, masks, w1s, shift, w2t, b2c)
    try:
        out_flat = jax.block_until_ready(build(True)(*args))
    except Exception:
        # TODO(synk): drop this fallback once pl.Buffered(1) is confirmed on
        # the target JAX version.
        out_flat = build(False)(*args)

    return out_flat.reshape(N, De, H, W)                              # already NCHW


def heade_reference(x_nchw, params):
    """Pure-JAX f32 reference (eval-mode BN), NCHW in / NCHW out."""
    w1, b1, gamma, beta, rmean, rvar, w2, b2 = params
    eps = 1e-5
    x = jnp.transpose(x_nchw, (0, 2, 3, 1))
    y = lax.conv_general_dilated(
        x, w1, window_strides=(1, 1), padding="SAME",
        dimension_numbers=("NHWC", "HWIO", "NHWC")) + b1
    y = (y - rmean) * (gamma / jnp.sqrt(rvar + eps)) + beta
    y = jnp.maximum(y, 0.0)
    out = lax.conv_general_dilated(
        y, w2[None, None], window_strides=(1, 1), padding="SAME",
        dimension_numbers=("NHWC", "HWIO", "NHWC")) + b2
    return jnp.transpose(out, (0, 3, 1, 2))


def make_params(key, in_ch, De, mid_ch=None):
    mid = mid_ch or in_ch
    ks = jax.random.split(key, 8)
    w1 = jax.random.normal(ks[0], (3, 3, in_ch, mid), jnp.float32) * 0.1   # HWIO
    b1 = jax.random.normal(ks[1], (mid,), jnp.float32) * 0.05
    gamma = 1.0 + 0.1 * jax.random.normal(ks[2], (mid,), jnp.float32)
    beta = 0.1 * jax.random.normal(ks[3], (mid,), jnp.float32)
    rmean = 0.1 * jax.random.normal(ks[4], (mid,), jnp.float32)
    rvar = 1.0 + 0.2 * jax.random.uniform(ks[5], (mid,), jnp.float32)
    w2 = jax.random.normal(ks[6], (mid, De), jnp.float32) * 0.1            # IO (1x1)
    b2 = jax.random.normal(ks[7], (De,), jnp.float32) * 0.05
    return (w1, b1, gamma, beta, rmean, rvar, w2, b2)


if __name__ == "__main__":
    key = jax.random.PRNGKey(0)
    kx, kp = jax.random.split(key)

    N, in_ch, H, W = 2, 4, 16, 16
    De = 4
    x = jax.random.normal(kx, (N, in_ch, H, W), jnp.float32)   # PyTorch NCHW input
    params = make_params(kp, in_ch, De)

    out = heade_forward(x, params)
    out = jax.block_until_ready(out)

    ref = heade_reference(x, params)
    assert out.shape == (N, De, H, W), out.shape
    # bf16 MXU operands with f32 accumulation -> tolerance loosened vs pure-f32.
    assert jnp.allclose(out, ref, atol=2e-2, rtol=2e-2), \
        float(jnp.max(jnp.abs(out - ref)))

    print("KERNEL_OK")
</pallas_src>

<mosaic_0001>
module attributes {stable_mosaic.version = 11 : i64} {
  func.func @heade_kernel(%arg0: i32, %arg1: i32, %arg2: memref<1x4x290xbf16, #tpu.memory_space<vmem>>, %arg3: memref<2x256xbf16, #tpu.memory_space<vmem>>, %arg4: memref<9x4x4xbf16, #tpu.memory_space<vmem>>, %arg5: memref<4x1xf32, #tpu.memory_space<vmem>>, %arg6: memref<4x4xbf16, #tpu.memory_space<vmem>>, %arg7: memref<4x1xf32, #tpu.memory_space<vmem>>, %arg8: memref<1x4x256xf32, #tpu.memory_space<vmem>>) attributes {dimension_semantics = [#tpu.dimension_semantics<parallel>, #tpu.dimension_semantics<parallel>], iteration_bounds = array<i64: 2, 1>, scalar_prefetch = 0 : i64, scratch_operands = 0 : i64, tpu.core_type = #tpu.core_type<tc>, window_params = [{transform_indices = @transform_0, window_bounds = array<i64: 1, 4, 290>}, {transform_indices = @transform_1, window_bounds = array<i64: 2, 256>}, {pipeline_mode = #tpu.pipeline_mode<synchronous>, transform_indices = @transform_2, window_bounds = array<i64: 9, 4, 4>}, {pipeline_mode = #tpu.pipeline_mode<synchronous>, transform_indices = @transform_3, window_bounds = array<i64: 4, 1>}, {pipeline_mode = #tpu.pipeline_mode<synchronous>, transform_indices = @transform_4, window_bounds = array<i64: 4, 4>}, {pipeline_mode = #tpu.pipeline_mode<synchronous>, transform_indices = @transform_5, window_bounds = array<i64: 4, 1>}, {transform_indices = @transform_6, window_bounds = array<i64: 1, 4, 256>}]} {
    %c0 = arith.constant 0 : index
    %c0_0 = arith.constant 0 : index
    %0 = vector.load %arg3[%c0, %c0_0] : memref<2x256xbf16, #tpu.memory_space<vmem>>, vector<1x256xbf16>
    %c1 = arith.constant 1 : index
    %c0_1 = arith.constant 0 : index
    %1 = vector.load %arg3[%c1, %c0_1] : memref<2x256xbf16, #tpu.memory_space<vmem>>, vector<1x256xbf16>
    %c0_2 = arith.constant 0 : index
    %c0_3 = arith.constant 0 : index
    %c0_4 = arith.constant 0 : index
    %2 = vector.load %arg2[%c0_2, %c0_3, %c0_4] : memref<1x4x290xbf16, #tpu.memory_space<vmem>>, vector<1x4x256xbf16>
    %3 = vector.shape_cast %2 : vector<1x4x256xbf16> to vector<4x256xbf16>
    %4 = vector.broadcast %0 : vector<1x256xbf16> to vector<4x256xbf16>
    %5 = arith.mulf %3, %4 : vector<4x256xbf16>
    %c0_5 = arith.constant 0 : index
    %c0_6 = arith.constant 0 : index
    %c0_7 = arith.constant 0 : index
    %6 = vector.load %arg4[%c0_5, %c0_6, %c0_7] : memref<9x4x4xbf16, #tpu.memory_space<vmem>>, vector<1x4x4xbf16>
    %7 = vector.shape_cast %6 : vector<1x4x4xbf16> to vector<4x4xbf16>
    %cst = arith.constant dense<0.000000e+00> : vector<4x256xf32>
    %8 = tpu.matmul %7, %5, %cst {dimension_numbers = #tpu.dot_dimension_numbers<[1], [0], [0], [1], [0, 0, 1, 1], [], []>} : vector<4x4xbf16>, vector<4x256xbf16>, vector<4x256xf32> -> vector<4x256xf32>
    %c0_8 = arith.constant 0 : index
    %c0_9 = arith.constant 0 : index
    %c1_10 = arith.constant 1 : index
    %9 = vector.load %arg2[%c0_8, %c0_9, %c1_10] : memref<1x4x290xbf16, #tpu.memory_space<vmem>>, vector<1x4x256xbf16>
    %10 = vector.shape_cast %9 : vector<1x4x256xbf16> to vector<4x256xbf16>
    %c1_11 = arith.constant 1 : index
    %c0_12 = arith.constant 0 : index
    %c0_13 = arith.constant 0 : index
    %11 = vector.load %arg4[%c1_11, %c0_12, %c0_13] : memref<9x4x4xbf16, #tpu.memory_space<vmem>>, vector<1x4x4xbf16>
    %12 = vector.shape_cast %11 : vector<1x4x4xbf16> to vector<4x4xbf16>
    %cst_14 = arith.constant dense<0.000000e+00> : vector<4x256xf32>
    %13 = tpu.matmul %12, %10, %cst_14 {dimension_numbers = #tpu.dot_dimension_numbers<[1], [0], [0], [1], [0, 0, 1, 1], [], []>} : vector<4x4xbf16>, vector<4x256xbf16>, vector<4x256xf32> -> vector<4x256xf32>
    %14 = arith.addf %8, %13 : vector<4x256xf32>
    %c0_15 = arith.constant 0 : index
    %c0_16 = arith.constant 0 : index
    %c2 = arith.constant 2 : index
    %15 = vector.load %arg2[%c0_15, %c0_16, %c2] : memref<1x4x290xbf16, #tpu.memory_space<vmem>>, vector<1x4x256xbf16>
    %16 = vector.shape_cast %15 : vector<1x4x256xbf16> to vector<4x256xbf16>
    %17 = vector.broadcast %1 : vector<1x256xbf16> to vector<4x256xbf16>
    %18 = arith.mulf %16, %17 : vector<4x256xbf16>
    %c2_17 = arith.constant 2 : index
    %c0_18 = arith.constant 0 : index
    %c0_19 = arith.constant 0 : index
    %19 = vector.load %arg4[%c2_17, %c0_18, %c0_19] : memref<9x4x4xbf16, #tpu.memory_space<vmem>>, vector<1x4x4xbf16>
    %20 = vector.shape_cast %19 : vector<1x4x4xbf16> to vector<4x4xbf16>
    %cst_20 = arith.constant dense<0.000000e+00> : vector<4x256xf32>
    %21 = tpu.matmul %20, %18, %cst_20 {dimension_numbers = #tpu.dot_dimension_numbers<[1], [0], [0], [1], [0, 0, 1, 1], [], []>} : vector<4x4xbf16>, vector<4x256xbf16>, vector<4x256xf32> -> vector<4x256xf32>
    %22 = arith.addf %14, %21 : vector<4x256xf32>
    %c0_21 = arith.constant 0 : index
    %c0_22 = arith.constant 0 : index
    %c16 = arith.constant 16 : index
    %23 = vector.load %arg2[%c0_21, %c0_22, %c16] : memref<1x4x290xbf16, #tpu.memory_space<vmem>>, vector<1x4x256xbf16>
    %24 = vector.shape_cast %23 : vector<1x4x256xbf16> to vector<4x256xbf16>
    %25 = vector.broadcast %0 : vector<1x256xbf16> to vector<4x256xbf16>
    %26 = arith.mulf %24, %25 : vector<4x256xbf16>
    %c3 = arith.constant 3 : index
    %c0_23 = arith.constant 0 : index
    %c0_24 = arith.constant 0 : index
    %27 = vector.load %arg4[%c3, %c0_23, %c0_24] : memref<9x4x4xbf16, #tpu.memory_space<vmem>>, vector<1x4x4xbf16>
    %28 = vector.shape_cast %27 : vector<1x4x4xbf16> to vector<4x4xbf16>
    %cst_25 = arith.constant dense<0.000000e+00> : vector<4x256xf32>
    %29 = tpu.matmul %28, %26, %cst_25 {dimension_numbers = #tpu.dot_dimension_numbers<[1], [0], [0], [1], [0, 0, 1, 1], [], []>} : vector<4x4xbf16>, vector<4x256xbf16>, vector<4x256xf32> -> vector<4x256xf32>
    %30 = arith.addf %22, %29 : vector<4x256xf32>
    %c0_26 = arith.constant 0 : index
    %c0_27 = arith.constant 0 : index
    %c17 = arith.constant 17 : index
    %31 = vector.load %arg2[%c0_26, %c0_27, %c17] : memref<1x4x290xbf16, #tpu.memory_space<vmem>>, vector<1x4x256xbf16>
    %32 = vector.shape_cast %31 : vector<1x4x256xbf16> to vector<4x256xbf16>
    %c4 = arith.constant 4 : index
    %c0_28 = arith.constant 0 : index
    %c0_29 = arith.constant 0 : index
    %33 = vector.load %arg4[%c4, %c0_28, %c0_29] : memref<9x4x4xbf16, #tpu.memory_space<vmem>>, vector<1x4x4xbf16>
    %34 = vector.shape_cast %33 : vector<1x4x4xbf16> to vector<4x4xbf16>
    %cst_30 = arith.constant dense<0.000000e+00> : vector<4x256xf32>
    %35 = tpu.matmul %34, %32, %cst_30 {dimension_numbers = #tpu.dot_dimension_numbers<[1], [0], [0], [1], [0, 0, 1, 1], [], []>} : vector<4x4xbf16>, vector<4x256xbf16>, vector<4x256xf32> -> vector<4x256xf32>
    %36 = arith.addf %30, %35 : vector<4x256xf32>
    %c0_31 = arith.constant 0 : index
    %c0_32 = arith.constant 0 : index
    %c18 = arith.constant 18 : index
    %37 = vector.load %arg2[%c0_31, %c0_32, %c18] : memref<1x4x290xbf16, #tpu.memory_space<vmem>>, vector<1x4x256xbf16>
    %38 = vector.shape_cast %37 : vector<1x4x256xbf16> to vector<4x256xbf16>
    %39 = vector.broadcast %1 : vector<1x256xbf16> to vector<4x256xbf16>
    %40 = arith.mulf %38, %39 : vector<4x256xbf16>
    %c5 = arith.constant 5 : index
    %c0_33 = arith.constant 0 : index
    %c0_34 = arith.constant 0 : index
    %41 = vector.load %arg4[%c5, %c0_33, %c0_34] : memref<9x4x4xbf16, #tpu.memory_space<vmem>>, vector<1x4x4xbf16>
    %42 = vector.shape_cast %41 : vector<1x4x4xbf16> to vector<4x4xbf16>
    %cst_35 = arith.constant dense<0.000000e+00> : vector<4x256xf32>
    %43 = tpu.matmul %42, %40, %cst_35 {dimension_numbers = #tpu.dot_dimension_numbers<[1], [0], [0], [1], [0, 0, 1, 1], [], []>} : vector<4x4xbf16>, vector<4x256xbf16>, vector<4x256xf32> -> vector<4x256xf32>
    %44 = arith.addf %36, %43 : vector<4x256xf32>
    %c0_36 = arith.constant 0 : index
    %c0_37 = arith.constant 0 : index
    %c32 = arith.constant 32 : index
    %45 = vector.load %arg2[%c0_36, %c0_37, %c32] : memref<1x4x290xbf16, #tpu.memory_space<vmem>>, vector<1x4x256xbf16>
    %46 = vector.shape_cast %45 : vector<1x4x256xbf16> to vector<4x256xbf16>
    %47 = vector.broadcast %0 : vector<1x256xbf16> to vector<4x256xbf16>
    %48 = arith.mulf %46, %47 : vector<4x256xbf16>
    %c6 = arith.constant 6 : index
    %c0_38 = arith.constant 0 : index
    %c0_39 = arith.constant 0 : index
    %49 = vector.load %arg4[%c6, %c0_38, %c0_39] : memref<9x4x4xbf16, #tpu.memory_space<vmem>>, vector<1x4x4xbf16>
    %50 = vector.shape_cast %49 : vector<1x4x4xbf16> to vector<4x4xbf16>
    %cst_40 = arith.constant dense<0.000000e+00> : vector<4x256xf32>
    %51 = tpu.matmul %50, %48, %cst_40 {dimension_numbers = #tpu.dot_dimension_numbers<[1], [0], [0], [1], [0, 0, 1, 1], [], []>} : vector<4x4xbf16>, vector<4x256xbf16>, vector<4x256xf32> -> vector<4x256xf32>
    %52 = arith.addf %44, %51 : vector<4x256xf32>
    %c0_41 = arith.constant 0 : index
    %c0_42 = arith.constant 0 : index
    %c33 = arith.constant 33 : index
    %53 = vector.load %arg2[%c0_41, %c0_42, %c33] : memref<1x4x290xbf16, #tpu.memory_space<vmem>>, vector<1x4x256xbf16>
    %54 = vector.shape_cast %53 : vector<1x4x256xbf16> to vector<4x256xbf16>
    %c7 = arith.constant 7 : index
    %c0_43 = arith.constant 0 : index
    %c0_44 = arith.constant 0 : index
    %55 = vector.load %arg4[%c7, %c0_43, %c0_44] : memref<9x4x4xbf16, #tpu.memory_space<vmem>>, vector<1x4x4xbf16>
    %56 = vector.shape_cast %55 : vector<1x4x4xbf16> to vector<4x4xbf16>
    %cst_45 = arith.constant dense<0.000000e+00> : vector<4x256xf32>
    %57 = tpu.matmul %56, %54, %cst_45 {dimension_numbers = #tpu.dot_dimension_numbers<[1], [0], [0], [1], [0, 0, 1, 1], [], []>} : vector<4x4xbf16>, vector<4x256xbf16>, vector<4x256xf32> -> vector<4x256xf32>
    %58 = arith.addf %52, %57 : vector<4x256xf32>
    %c0_46 = arith.constant 0 : index
    %c0_47 = arith.constant 0 : index
    %c34 = arith.constant 34 : index
    %59 = vector.load %arg2[%c0_46, %c0_47, %c34] : memref<1x4x290xbf16, #tpu.memory_space<vmem>>, vector<1x4x256xbf16>
    %60 = vector.shape_cast %59 : vector<1x4x256xbf16> to vector<4x256xbf16>
    %61 = vector.broadcast %1 : vector<1x256xbf16> to vector<4x256xbf16>
    %62 = arith.mulf %60, %61 : vector<4x256xbf16>
    %c8 = arith.constant 8 : index
    %c0_48 = arith.constant 0 : index
    %c0_49 = arith.constant 0 : index
    %63 = vector.load %arg4[%c8, %c0_48, %c0_49] : memref<9x4x4xbf16, #tpu.memory_space<vmem>>, vector<1x4x4xbf16>
    %64 = vector.shape_cast %63 : vector<1x4x4xbf16> to vector<4x4xbf16>
    %cst_50 = arith.constant dense<0.000000e+00> : vector<4x256xf32>
    %65 = tpu.matmul %64, %62, %cst_50 {dimension_numbers = #tpu.dot_dimension_numbers<[1], [0], [0], [1], [0, 0, 1, 1], [], []>} : vector<4x4xbf16>, vector<4x256xbf16>, vector<4x256xf32> -> vector<4x256xf32>
    %66 = arith.addf %58, %65 : vector<4x256xf32>
    %c0_51 = arith.constant 0 : index
    %c0_52 = arith.constant 0 : index
    %67 = vector.load %arg5[%c0_51, %c0_52] : memref<4x1xf32, #tpu.memory_space<vmem>>, vector<4x1xf32>
    %68 = vector.broadcast %67 : vector<4x1xf32> to vector<4x256xf32>
    %69 = arith.addf %66, %68 : vector<4x256xf32>
    %cst_53 = arith.constant 0.000000e+00 : f32
    %70 = vector.broadcast %cst_53 : f32 to vector<4x256xf32>
    %71 = arith.maximumf %69, %70 : vector<4x256xf32>
    %c0_54 = arith.constant 0 : index
    %c0_55 = arith.constant 0 : index
    %72 = vector.load %arg6[%c0_54, %c0_55] : memref<4x4xbf16, #tpu.memory_space<vmem>>, vector<4x4xbf16>
    %73 = arith.truncf %71 : vector<4x256xf32> to vector<4x256xbf16>
    %cst_56 = arith.constant dense<0.000000e+00> : vector<4x256xf32>
    %74 = tpu.matmul %72, %73, %cst_56 {dimension_numbers = #tpu.dot_dimension_numbers<[1], [0], [0], [1], [0, 0, 1, 1], [], []>} : vector<4x4xbf16>, vector<4x256xbf16>, vector<4x256xf32> -> vector<4x256xf32>
    %c0_57 = arith.constant 0 : index
    %c0_58 = arith.constant 0 : index
    %75 = vector.load %arg7[%c0_57, %c0_58] : memref<4x1xf32, #tpu.memory_space<vmem>>, vector<4x1xf32>
    %76 = vector.broadcast %75 : vector<4x1xf32> to vector<4x256xf32>
    %77 = arith.addf %74, %76 : vector<4x256xf32>
    %c0_59 = arith.constant 0 : index
    %c0_60 = arith.constant 0 : index
    %c0_61 = arith.constant 0 : index
    %78 = vector.load %arg8[%c0_59, %c0_60, %c0_61] : memref<1x4x256xf32, #tpu.memory_space<vmem>>, vector<1x4x256xf32>
    %79 = vector.shape_cast %78 : vector<1x4x256xf32> to vector<4x256xf32>
    %80 = vector.shape_cast %77 : vector<4x256xf32> to vector<1x4x256xf32>
    tpu.vector_store %arg8[%c0_59, %c0_60, %c0_61], %80 {strides = array<i32>} : memref<1x4x256xf32, #tpu.memory_space<vmem>>, vector<1x4x256xf32>,
    return
  }
  func.func @transform_0(%arg0: i32, %arg1: i32) -> (i32, i32, i32) {
    %c0_i32 = arith.constant 0 : i32
    %c0_i32_0 = arith.constant 0 : i32
    %c0_i32_1 = arith.constant 0 : i32
    return %arg0, %c0_i32, %c0_i32_0 : i32, i32, i32
  }
  func.func @transform_1(%arg0: i32, %arg1: i32) -> (i32, i32) {
    %c0_i32 = arith.constant 0 : i32
    %c0_i32_0 = arith.constant 0 : i32
    return %c0_i32, %arg1 : i32, i32
  }
  func.func @transform_2(%arg0: i32, %arg1: i32) -> (i32, i32, i32) {
    %c0_i32 = arith.constant 0 : i32
    %c0_i32_0 = arith.constant 0 : i32
    %c0_i32_1 = arith.constant 0 : i32
    %c0_i32_2 = arith.constant 0 : i32
    return %c0_i32, %c0_i32_0, %c0_i32_1 : i32, i32, i32
  }
  func.func @transform_3(%arg0: i32, %arg1: i32) -> (i32, i32) {
    %c0_i32 = arith.constant 0 : i32
    %c0_i32_0 = arith.constant 0 : i32
    %c0_i32_1 = arith.constant 0 : i32
    return %c0_i32, %c0_i32_0 : i32, i32
  }
  func.func @transform_4(%arg0: i32, %arg1: i32) -> (i32, i32) {
    %c0_i32 = arith.constant 0 : i32
    %c0_i32_0 = arith.constant 0 : i32
    %c0_i32_1 = arith.constant 0 : i32
    return %c0_i32, %c0_i32_0 : i32, i32
  }
  func.func @transform_5(%arg0: i32, %arg1: i32) -> (i32, i32) {
    %c0_i32 = arith.constant 0 : i32
    %c0_i32_0 = arith.constant 0 : i32
    %c0_i32_1 = arith.constant 0 : i32
    return %c0_i32, %c0_i32_0 : i32, i32
  }
  func.func @transform_6(%arg0: i32, %arg1: i32) -> (i32, i32, i32) {
    %c0_i32 = arith.constant 0 : i32
    %c0_i32_0 = arith.constant 0 : i32
    return %arg0, %c0_i32, %arg1 : i32, i32, i32
  }
}

module attributes {stable_mosaic.version = 11 : i64} {
  func.func @heade_kernel(%arg0: i32, %arg1: i32, %arg2: memref<1x4x290xbf16, #tpu.memory_space<vmem>>, %arg3: memref<2x256xbf16, #tpu.memory_space<vmem>>, %arg4: memref<9x4x4xbf16, #tpu.memory_space<vmem>>, %arg5: memref<4x1xf32, #tpu.memory_space<vmem>>, %arg6: memref<4x4xbf16, #tpu.memory_space<vmem>>, %arg7: memref<4x1xf32, #tpu.memory_space<vmem>>, %arg8: memref<1x4x256xf32, #tpu.memory_space<vmem>>) attributes {dimension_semantics = [#tpu.dimension_semantics<parallel>, #tpu.dimension_semantics<parallel>], iteration_bounds = array<i64: 2, 1>, scalar_prefetch = 0 : i64, scratch_operands = 0 : i64, tpu.core_type = #tpu.core_type<tc>, window_params = [{transform_indices = @transform_0, window_bounds = array<i64: 1, 4, 290>}, {transform_indices = @transform_1, window_bounds = array<i64: 2, 256>}, {pipeline_mode = #tpu.pipeline_mode<synchronous>, transform_indices = @transform_2, window_bounds = array<i64: 9, 4, 4>}, {pipeline_mode = #tpu.pipeline_mode<synchronous>, transform_indices = @transform_3, window_bounds = array<i64: 4, 1>}, {pipeline_mode = #tpu.pipeline_mode<synchronous>, transform_indices = @transform_4, window_bounds = array<i64: 4, 4>}, {pipeline_mode = #tpu.pipeline_mode<synchronous>, transform_indices = @transform_5, window_bounds = array<i64: 4, 1>}, {transform_indices = @transform_6, window_bounds = array<i64: 1, 4, 256>}]} {
    %c0 = arith.constant 0 : index
    %c0_0 = arith.constant 0 : index
    %0 = vector.load %arg3[%c0, %c0_0] : memref<2x256xbf16, #tpu.memory_space<vmem>>, vector<1x256xbf16>
    %c1 = arith.constant 1 : index
    %c0_1 = arith.constant 0 : index
    %1 = vector.load %arg3[%c1, %c0_1] : memref<2x256xbf16, #tpu.memory_space<vmem>>, vector<1x256xbf16>
    %c0_2 = arith.constant 0 : index
    %c0_3 = arith.constant 0 : index
    %c0_4 = arith.constant 0 : index
    %2 = vector.load %arg2[%c0_2, %c0_3, %c0_4] : memref<1x4x290xbf16, #tpu.memory_space<vmem>>, vector<1x4x256xbf16>
    %3 = vector.shape_cast %2 : vector<1x4x256xbf16> to vector<4x256xbf16>
    %4 = vector.broadcast %0 : vector<1x256xbf16> to vector<4x256xbf16>
    %5 = arith.mulf %3, %4 : vector<4x256xbf16>
    %c0_5 = arith.constant 0 : index
    %c0_6 = arith.constant 0 : index
    %c0_7 = arith.constant 0 : index
    %6 = vector.load %arg4[%c0_5, %c0_6, %c0_7] : memref<9x4x4xbf16, #tpu.memory_space<vmem>>, vector<1x4x4xbf16>
    %7 = vector.shape_cast %6 : vector<1x4x4xbf16> to vector<4x4xbf16>
    %cst = arith.constant dense<0.000000e+00> : vector<4x256xf32>
    %8 = tpu.matmul %7, %5, %cst {dimension_numbers = #tpu.dot_dimension_numbers<[1], [0], [0], [1], [0, 0, 1, 1], [], []>} : vector<4x4xbf16>, vector<4x256xbf16>, vector<4x256xf32> -> vector<4x256xf32>
    %c0_8 = arith.constant 0 : index
    %c0_9 = arith.constant 0 : index
    %c1_10 = arith.constant 1 : index
    %9 = vector.load %arg2[%c0_8, %c0_9, %c1_10] : memref<1x4x290xbf16, #tpu.memory_space<vmem>>, vector<1x4x256xbf16>
    %10 = vector.shape_cast %9 : vector<1x4x256xbf16> to vector<4x256xbf16>
    %c1_11 = arith.constant 1 : index
    %c0_12 = arith.constant 0 : index
    %c0_13 = arith.constant 0 : index
    %11 = vector.load %arg4[%c1_11, %c0_12, %c0_13] : memref<9x4x4xbf16, #tpu.memory_space<vmem>>, vector<1x4x4xbf16>
    %12 = vector.shape_cast %11 : vector<1x4x4xbf16> to vector<4x4xbf16>
    %cst_14 = arith.constant dense<0.000000e+00> : vector<4x256xf32>
    %13 = tpu.matmul %12, %10, %cst_14 {dimension_numbers = #tpu.dot_dimension_numbers<[1], [0], [0], [1], [0, 0, 1, 1], [], []>} : vector<4x4xbf16>, vector<4x256xbf16>, vector<4x256xf32> -> vector<4x256xf32>
    %14 = arith.addf %8, %13 : vector<4x256xf32>
    %c0_15 = arith.constant 0 : index
    %c0_16 = arith.constant 0 : index
    %c2 = arith.constant 2 : index
    %15 = vector.load %arg2[%c0_15, %c0_16, %c2] : memref<1x4x290xbf16, #tpu.memory_space<vmem>>, vector<1x4x256xbf16>
    %16 = vector.shape_cast %15 : vector<1x4x256xbf16> to vector<4x256xbf16>
    %17 = vector.broadcast %1 : vector<1x256xbf16> to vector<4x256xbf16>
    %18 = arith.mulf %16, %17 : vector<4x256xbf16>
    %c2_17 = arith.constant 2 : index
    %c0_18 = arith.constant 0 : index
    %c0_19 = arith.constant 0 : index
    %19 = vector.load %arg4[%c2_17, %c0_18, %c0_19] : memref<9x4x4xbf16, #tpu.memory_space<vmem>>, vector<1x4x4xbf16>
    %20 = vector.shape_cast %19 : vector<1x4x4xbf16> to vector<4x4xbf16>
    %cst_20 = arith.constant dense<0.000000e+00> : vector<4x256xf32>
    %21 = tpu.matmul %20, %18, %cst_20 {dimension_numbers = #tpu.dot_dimension_numbers<[1], [0], [0], [1], [0, 0, 1, 1], [], []>} : vector<4x4xbf16>, vector<4x256xbf16>, vector<4x256xf32> -> vector<4x256xf32>
    %22 = arith.addf %14, %21 : vector<4x256xf32>
    %c0_21 = arith.constant 0 : index
    %c0_22 = arith.constant 0 : index
    %c16 = arith.constant 16 : index
    %23 = vector.load %arg2[%c0_21, %c0_22, %c16] : memref<1x4x290xbf16, #tpu.memory_space<vmem>>, vector<1x4x256xbf16>
    %24 = vector.shape_cast %23 : vector<1x4x256xbf16> to vector<4x256xbf16>
    %25 = vector.broadcast %0 : vector<1x256xbf16> to vector<4x256xbf16>
    %26 = arith.mulf %24, %25 : vector<4x256xbf16>
    %c3 = arith.constant 3 : index
    %c0_23 = arith.constant 0 : index
    %c0_24 = arith.constant 0 : index
    %27 = vector.load %arg4[%c3, %c0_23, %c0_24] : memref<9x4x4xbf16, #tpu.memory_space<vmem>>, vector<1x4x4xbf16>
    %28 = vector.shape_cast %27 : vector<1x4x4xbf16> to vector<4x4xbf16>
    %cst_25 = arith.constant dense<0.000000e+00> : vector<4x256xf32>
    %29 = tpu.matmul %28, %26, %cst_25 {dimension_numbers = #tpu.dot_dimension_numbers<[1], [0], [0], [1], [0, 0, 1, 1], [], []>} : vector<4x4xbf16>, vector<4x256xbf16>, vector<4x256xf32> -> vector<4x256xf32>
    %30 = arith.addf %22, %29 : vector<4x256xf32>
    %c0_26 = arith.constant 0 : index
    %c0_27 = arith.constant 0 : index
    %c17 = arith.constant 17 : index
    %31 = vector.load %arg2[%c0_26, %c0_27, %c17] : memref<1x4x290xbf16, #tpu.memory_space<vmem>>, vector<1x4x256xbf16>
    %32 = vector.shape_cast %31 : vector<1x4x256xbf16> to vector<4x256xbf16>
    %c4 = arith.constant 4 : index
    %c0_28 = arith.constant 0 : index
    %c0_29 = arith.constant 0 : index
    %33 = vector.load %arg4[%c4, %c0_28, %c0_29] : memref<9x4x4xbf16, #tpu.memory_space<vmem>>, vector<1x4x4xbf16>
    %34 = vector.shape_cast %33 : vector<1x4x4xbf16> to vector<4x4xbf16>
    %cst_30 = arith.constant dense<0.000000e+00> : vector<4x256xf32>
    %35 = tpu.matmul %34, %32, %cst_30 {dimension_numbers = #tpu.dot_dimension_numbers<[1], [0], [0], [1], [0, 0, 1, 1], [], []>} : vector<4x4xbf16>, vector<4x256xbf16>, vector<4x256xf32> -> vector<4x256xf32>
    %36 = arith.addf %30, %35 : vector<4x256xf32>
    %c0_31 = arith.constant 0 : index
    %c0_32 = arith.constant 0 : index
    %c18 = arith.constant 18 : index
    %37 = vector.load %arg2[%c0_31, %c0_32, %c18] : memref<1x4x290xbf16, #tpu.memory_space<vmem>>, vector<1x4x256xbf16>
    %38 = vector.shape_cast %37 : vector<1x4x256xbf16> to vector<4x256xbf16>
    %39 = vector.broadcast %1 : vector<1x256xbf16> to vector<4x256xbf16>
    %40 = arith.mulf %38, %39 : vector<4x256xbf16>
    %c5 = arith.constant 5 : index
    %c0_33 = arith.constant 0 : index
    %c0_34 = arith.constant 0 : index
    %41 = vector.load %arg4[%c5, %c0_33, %c0_34] : memref<9x4x4xbf16, #tpu.memory_space<vmem>>, vector<1x4x4xbf16>
    %42 = vector.shape_cast %41 : vector<1x4x4xbf16> to vector<4x4xbf16>
    %cst_35 = arith.constant dense<0.000000e+00> : vector<4x256xf32>
    %43 = tpu.matmul %42, %40, %cst_35 {dimension_numbers = #tpu.dot_dimension_numbers<[1], [0], [0], [1], [0, 0, 1, 1], [], []>} : vector<4x4xbf16>, vector<4x256xbf16>, vector<4x256xf32> -> vector<4x256xf32>
    %44 = arith.addf %36, %43 : vector<4x256xf32>
    %c0_36 = arith.constant 0 : index
    %c0_37 = arith.constant 0 : index
    %c32 = arith.constant 32 : index
    %45 = vector.load %arg2[%c0_36, %c0_37, %c32] : memref<1x4x290xbf16, #tpu.memory_space<vmem>>, vector<1x4x256xbf16>
    %46 = vector.shape_cast %45 : vector<1x4x256xbf16> to vector<4x256xbf16>
    %47 = vector.broadcast %0 : vector<1x256xbf16> to vector<4x256xbf16>
    %48 = arith.mulf %46, %47 : vector<4x256xbf16>
    %c6 = arith.constant 6 : index
    %c0_38 = arith.constant 0 : index
    %c0_39 = arith.constant 0 : index
    %49 = vector.load %arg4[%c6, %c0_38, %c0_39] : memref<9x4x4xbf16, #tpu.memory_space<vmem>>, vector<1x4x4xbf16>
    %50 = vector.shape_cast %49 : vector<1x4x4xbf16> to vector<4x4xbf16>
    %cst_40 = arith.constant dense<0.000000e+00> : vector<4x256xf32>
    %51 = tpu.matmul %50, %48, %cst_40 {dimension_numbers = #tpu.dot_dimension_numbers<[1], [0], [0], [1], [0, 0, 1, 1], [], []>} : vector<4x4xbf16>, vector<4x256xbf16>, vector<4x256xf32> -> vector<4x256xf32>
    %52 = arith.addf %44, %51 : vector<4x256xf32>
    %c0_41 = arith.constant 0 : index
    %c0_42 = arith.constant 0 : index
    %c33 = arith.constant 33 : index
    %53 = vector.load %arg2[%c0_41, %c0_42, %c33] : memref<1x4x290xbf16, #tpu.memory_space<vmem>>, vector<1x4x256xbf16>
    %54 = vector.shape_cast %53 : vector<1x4x256xbf16> to vector<4x256xbf16>
    %c7 = arith.constant 7 : index
    %c0_43 = arith.constant 0 : index
    %c0_44 = arith.constant 0 : index
    %55 = vector.load %arg4[%c7, %c0_43, %c0_44] : memref<9x4x4xbf16, #tpu.memory_space<vmem>>, vector<1x4x4xbf16>
    %56 = vector.shape_cast %55 : vector<1x4x4xbf16> to vector<4x4xbf16>
    %cst_45 = arith.constant dense<0.000000e+00> : vector<4x256xf32>
    %57 = tpu.matmul %56, %54, %cst_45 {dimension_numbers = #tpu.dot_dimension_numbers<[1], [0], [0], [1], [0, 0, 1, 1], [], []>} : vector<4x4xbf16>, vector<4x256xbf16>, vector<4x256xf32> -> vector<4x256xf32>
    %58 = arith.addf %52, %57 : vector<4x256xf32>
    %c0_46 = arith.constant 0 : index
    %c0_47 = arith.constant 0 : index
    %c34 = arith.constant 34 : index
    %59 = vector.load %arg2[%c0_46, %c0_47, %c34] : memref<1x4x290xbf16, #tpu.memory_space<vmem>>, vector<1x4x256xbf16>
    %60 = vector.shape_cast %59 : vector<1x4x256xbf16> to vector<4x256xbf16>
    %61 = vector.broadcast %1 : vector<1x256xbf16> to vector<4x256xbf16>
    %62 = arith.mulf %60, %61 : vector<4x256xbf16>
    %c8 = arith.constant 8 : index
    %c0_48 = arith.constant 0 : index
    %c0_49 = arith.constant 0 : index
    %63 = vector.load %arg4[%c8, %c0_48, %c0_49] : memref<9x4x4xbf16, #tpu.memory_space<vmem>>, vector<1x4x4xbf16>
    %64 = vector.shape_cast %63 : vector<1x4x4xbf16> to vector<4x4xbf16>
    %cst_50 = arith.constant dense<0.000000e+00> : vector<4x256xf32>
    %65 = tpu.matmul %64, %62, %cst_50 {dimension_numbers = #tpu.dot_dimension_numbers<[1], [0], [0], [1], [0, 0, 1, 1], [], []>} : vector<4x4xbf16>, vector<4x256xbf16>, vector<4x256xf32> -> vector<4x256xf32>
    %66 = arith.addf %58, %65 : vector<4x256xf32>
    %c0_51 = arith.constant 0 : index
    %c0_52 = arith.constant 0 : index
    %67 = vector.load %arg5[%c0_51, %c0_52] : memref<4x1xf32, #tpu.memory_space<vmem>>, vector<4x1xf32>
    %68 = vector.broadcast %67 : vector<4x1xf32> to vector<4x256xf32>
    %69 = arith.addf %66, %68 : vector<4x256xf32>
    %cst_53 = arith.constant 0.000000e+00 : f32
    %70 = vector.broadcast %cst_53 : f32 to vector<4x256xf32>
    %71 = arith.maximumf %69, %70 : vector<4x256xf32>
    %c0_54 = arith.constant 0 : index
    %c0_55 = arith.constant 0 : index
    %72 = vector.load %arg6[%c0_54, %c0_55] : memref<4x4xbf16, #tpu.memory_space<vmem>>, vector<4x4xbf16>
    %73 = arith.truncf %71 : vector<4x256xf32> to vector<4x256xbf16>
    %cst_56 = arith.constant dense<0.000000e+00> : vector<4x256xf32>
    %74 = tpu.matmul %72, %73, %cst_56 {dimension_numbers = #tpu.dot_dimension_numbers<[1], [0], [0], [1], [0, 0, 1, 1], [], []>} : vector<4x4xbf16>, vector<4x256xbf16>, vector<4x256xf32> -> vector<4x256xf32>
    %c0_57 = arith.constant 0 : index
    %c0_58 = arith.constant 0 : index
    %75 = vector.load %arg7[%c0_57, %c0_58] : memref<4x1xf32, #tpu.memory_space<vmem>>, vector<4x1xf32>
    %76 = vector.broadcast %75 : vector<4x1xf32> to vector<4x256xf32>
    %77 = arith.addf %74, %76 : vector<4x256xf32>
    %c0_59 = arith.constant 0 : index
    %c0_60 = arith.constant 0 : index
    %c0_61 = arith.constant 0 : index
    %78 = vector.load %arg8[%c0_59, %c0_60, %c0_61] : memref<1x4x256xf32, #tpu.memory_space<vmem>>, vector<1x4x256xf32>
    %79 = vector.shape_cast %78 : vector<1x4x256xf32> to vector<4x256xf32>
    %80 = vector.shape_cast %77 : vector<4x256xf32> to vector<1x4x256xf32>
    tpu.vector_store %arg8[%c0_59, %c0_60, %c0_61], %80 {strides = array<i32>} : memref<1x4x256xf32, #tpu.memory_space<vmem>>, vector<1x4x256xf32>,
    return
  }
  func.func @transform_0(%arg0: i32, %arg1: i32) -> (i32, i32, i32) {
    %c0_i32 = arith.constant 0 : i32
    %c0_i32_0 = arith.constant 0 : i32
    %c0_i32_1 = arith.constant 0 : i32
    return %arg0, %c0_i32, %c0_i32_0 : i32, i32, i32
  }
  func.func @transform_1(%arg0: i32, %arg1: i32) -> (i32, i32) {
    %c0_i32 = arith.constant 0 : i32
    %c0_i32_0 = arith.constant 0 : i32
    return %c0_i32, %arg1 : i32, i32
  }
  func.func @transform_2(%arg0: i32, %arg1: i32) -> (i32, i32, i32) {
    %c0_i32 = arith.constant 0 : i32
    %c0_i32_0 = arith.constant 0 : i32
    %c0_i32_1 = arith.constant 0 : i32
    %c0_i32_2 = arith.constant 0 : i32
    return %c0_i32, %c0_i32_0, %c0_i32_1 : i32, i32, i32
  }
  func.func @transform_3(%arg0: i32, %arg1: i32) -> (i32, i32) {
    %c0_i32 = arith.constant 0 : i32
    %c0_i32_0 = arith.constant 0 : i32
    %c0_i32_1 = arith.constant 0 : i32
    return %c0_i32, %c0_i32_0 : i32, i32
  }
  func.func @transform_4(%arg0: i32, %arg1: i32) -> (i32, i32) {
    %c0_i32 = arith.constant 0 : i32
    %c0_i32_0 = arith.constant 0 : i32
    %c0_i32_1 = arith.constant 0 : i32
    return %c0_i32, %c0_i32_0 : i32, i32
  }
  func.func @transform_5(%arg0: i32, %arg1: i32) -> (i32, i32) {
    %c0_i32 = arith.constant 0 : i32
    %c0_i32_0 = arith.constant 0 : i32
    %c0_i32_1 = arith.constant 0 : i32
    return %c0_i32, %c0_i32_0 : i32, i32
  }
  func.func @transform_6(%arg0: i32, %arg1: i32) -> (i32, i32, i32) {
    %c0_i32 = arith.constant 0 : i32
    %c0_i32_0 = arith.constant 0 : i32
    return %arg0, %c0_i32, %arg1 : i32, i32, i32
  }
}

</mosaic_0001>

<bundles_post_ra>
// kernel: tpu_custom_call.1
= control target key start
LH: loop header
LB: loop body
LE: loop exit
PB: predicated region body
PF: predicated region fallthrough
CT: control target
= control target key end

     0   :  { %11 = vsyncpa [#allocation3], 0  ;;  %s1756_s0 = inlined_call_operand.vmem [shape: bf16[2,4,290], index: 0, kind: input, shape index: {}]   ;;  %s1757_s1 = inlined_call_operand.vmem [shape: bf16[2,256], index: 1, kind: input, shape index: {}]   ;;  %s1758_s2 = inlined_call_operand.vmem [shape: bf16[9,4,4], index: 2, kind: input, shape index: {}]   ;;  %s1759_s3 = inlined_call_operand.vmem [shape: f32[4,1], index: 3, kind: input, shape index: {}]   ;;  %s1760_s4 = inlined_call_operand.vmem [shape: bf16[4,4], index: 4, kind: input, shape index: {}]   ;;  %s1761_s5 = inlined_call_operand.vmem [shape: f32[4,1], index: 5, kind: input, shape index: {}]   ;;  %s1762_s6 = inlined_call_operand.hbm [shape: f32[2,4,256], index: 6, kind: output, shape index: {}]  }
   0x1   :  { %13 = vsyncpa [#allocation3 + $0x1], 0  ;;  %s1528_s21 = smov 0   ;;  %s1530_s22 = smov 0  }
   0x2   :  { %s1532_s23 = smov 0   ;;  %s1534_s24 = smov 0  }
   0x3   :  { %s1536_s25 = smov 0   ;;  %s1538_s26 = smov 0  }
   0x4 LB: > { %s1276_s27 = sadd.s32 4294967295, %s1474_s26   ;;  %s1277_s28 = sadd.s32 4294967294, %s1474_s26   ;;  %s1474_s26 = sphi %s1538_s26, %s19_s26   ;;  %s1470_s25 = sphi %s1536_s25, %s1769_s25   ;;  %s1466_s24 = sphi %s1534_s24, %s1768_s24   ;;  %s1462_s23 = sphi %s1532_s23, %s1767_s23   ;;  %s1458_s22 = sphi %s1530_s22, %s1766_s22   ;;  %s1454_s21 = sphi %s1528_s21, %s1765_s21  }
   0x5   : > { %s31_s29 = sadd.s32 1, %s1470_s25  ;;  %s176_s30 = sadd.s32 1, %s1462_s23 }
   0x6   : > { %p33_p0 = scmp.ge.s32.totalorder %s31_s29, 2  ;;  %p186_p1 = scmp.ne.s32.totalorder %s1462_s23, %s1458_s22 }
   0x7   : > { %p187_p2 = scmp.eq.s32.totalorder %s1276_s27, 1  ;;  %p192_p3 = scmp.ne.s32.totalorder %s1458_s22, %s1454_s21 }
   0x8   : > { %s1771_s29 = smov (%p33_p0, %s31_s29), 0  ;;  %p193_p5 = scmp.eq.s32.totalorder %s1277_s28, 1 }
   0x9   : > { %p1568_p4 = por %p187_p2, %p186_p1  ;;  %s171_s8 = ssub.s32 %s1470_s25, %s1771_s29 }
   0xa   : > { %p1281_p6 = scmp.ge.s32.totalorder %s1474_s26, 1  ;;  %p174_p7 = scmp.eq.s32.totalorder %s171_s8, 0 }
   0xb   : > { %p1575_p8 = por %p193_p5, %p192_p3  ;;  %p239_p9 = scmp.lt.s32.totalorder %s1474_s26, 3 }
   0xc   : > { %s1581_s10 = scalar_select %p174_p7, %s1462_s23, %s176_s30  }
   0xd   : > { %p240_p10 = pnand %p1281_p6, %p239_p9 }
   0xe   : > { %v1284_v0 = vld.sshfl [vmem:[%s1757_s1] sm:$0x11 pattern:$0x75316420] (!%p240_p10)  ;;  %v299_v1 = vlaneseq (!%p240_p10)  ;;  %v1476_v2 = vmov (!%p240_p10), 1966171168  }
   0xf   : > { %243 = sbr.rel (%p240_p10) target bundleno = 767 (0x2ff), region = 44  ;;  %v297_v3 = vunpack.c.l.s4 (!%p240_p10), %v1476_v2  ;;  %v295_v5 = vcombine.high (!%p240_p10), %v1284_v0, %v1284_v0  ;;  %v1477_v7 = vmov (!%p240_p10), 1983009808   ;;  %p273_p11 = scmp.lt.s32.totalorder (!%p240_p10), %s1466_s24, 1  ;;  %vm370_vm0 = vcmask (!%p240_p10), 1041408  }
  0x10   : > { %v300_v4 = vshrl.u32 (!%p240_p10), %v299_v1, 7  ;;  %v328_v8 = vunpack.c.l.s4 (!%p240_p10), %v1477_v7  ;;  %s1478_s18 = smov (!%p240_p10), 2   ;;  %s1479_s19 = smov (!%p240_p10), 18   ;;  %v1485_v43 = vmov (!%p240_p10), 0   ;;  %vm505_vm1 = vcmask (!%p240_p10), 15360  }
  0x11   : > { %v298_v6 = vunpack.c.0.s8 (!%p240_p10), %v297_v3  ;;  %s1480_s20 = smov (!%p240_p10), 16   ;;  %s1481_s27 = smov (!%p240_p10), 32   ;;  %409 = vmatprep.mubr.bf16.mxu0 (!%p240_p10), %v1485_v43  ;;  %468 = vmatprep.mubr.bf16.mxu1 (!%p240_p10), %v1485_v43  ;;  %vm366_vm2 = vcmask (!%p240_p10), 31744   ;;  %v336_v49 = vld [vmem:[%s1758_s2] sm:$0x3] (!%p240_p10)  ;;  %vm593_vm3 = vcmask (!%p240_p10), 130048  }
  0x12   : > { %v315_v12 = vsub.s32 (!%p240_p10), 0, %v300_v4  ;;  %v329_v13 = vunpack.c.0.s8 (!%p240_p10), %v328_v8  ;;  %s1482_s28 = smov (!%p240_p10), 34   ;;  %s1483_s30 = smov (!%p240_p10), 127   ;;  %1391 = vset.pattern.permute.xlu1 (!%p240_p10), %v1485_v43  ;;  %1392 = vset.pattern.permute.xlu0 (!%p240_p10), %v1485_v43  ;;  %vm850_vm4 = vcmask (!%p240_p10), 261120   ;;  %vm363_vm5 = vcmask (!%p240_p10), 1039360  }
  0x13   : > { %v301_v9 = vsub.s32 (!%p240_p10), %v298_v6, %v300_v4  ;;  %s1484_s8 = smov (!%p240_p10), 111   ;;  %vm762_vm6 = vcmask (!%p240_p10), 146432   ;;  %vm1019_vm7 = vcmask (!%p240_p10), 277504   ;;  %vm622_vm8 = vcmask (!%p240_p10), 916480   ;;  %s1318_s15 = sshll.u32 (!%p240_p10), %s1466_s24, 7 }
  0x14   : > { %v1588_v22 = vsub.s32 (!%p240_p10), %v329_v13, %v300_v4  ;;  %vm534_vm9 = vcmask (!%p240_p10), 1031168   ;;  %vm703_vm10 = vcmask (!%p240_p10), 908288   ;;  %vm879_vm11 = vcmask (!%p240_p10), 785408  }
  0x15   : > { %v302_v10 = vrot.slane (!%p240_p10), %v1284_v0, %v301_v9  ;;  %v309_v11 = vrot.slane (!%p240_p10), %v295_v5, %v301_v9  ;;  %vm791_vm12 = vcmask (!%p240_p10), 900096   ;;  %vm960_vm13 = vcmask (!%p240_p10), 777216  }
  0x16   : > { %s274_s13 = scalar_select %p273_p11, %s1466_s24, 1  ;;  %vm1048_vm14 = vcmask 769024  }
  0x17   : > { %v478_v14 = vshrl.u32 %v302_v10, 16  ;;  %v485_v15 = vshrl.u32 %v309_v11, 16  ;;  %v311_v16 = vpack.i.b16 %v302_v10, %v302_v10  ;;  %v318_v17 = vpack.i.b16 %v309_v11, %v309_v11  ;;  %s1492_s24 = smov [#allocation2]  }
  0x18   : > { %s1319_s14 = smul.u32 6, %s274_s13  ;;  %s1486_s13 = smov 126  }
  0x19   : > { %v479_v18 = vpack.i.b16 %v478_v14, %v478_v14  ;;  %v486_v19 = vpack.i.b16 %v485_v15, %v485_v15  ;;  %v316_v20 = vrot.slane %v311_v16, %v315_v12  ;;  %v323_v21 = vrot.slane %v318_v17, %v315_v12  ;;  %v1285_v14 = vld [vmem:[%s1758_s2 + $0x2] sm:$0x3] }
  0x1a   : > { %s1594_s17 = scalar_lea.vmem %s1756_s0, %s1319_s14  ;;  %s1487_s14 = smov 112  }
  0x1b   : > { %v484_v23 = vrot.slane %v479_v18, %v315_v12  ;;  %v491_v24 = vrot.slane %v486_v19, %v315_v12  ;;  %v326_v26 = vcombine.low %v316_v20, %v323_v21  ;;  %v337_v29 = vld [vmem:[%s1594_s17] sm:$0x3f] }
  0x1c   : > { %v348_v30 = vrot.slane %v337_v29, %v1588_v22  ;;  %v341_v31 = vcombine.high %v337_v29, %v337_v29  ;;  %v677_v32 = vld [vmem:[%s1594_s17] sm:$0x3f] }
  0x1d   : > { %v494_v25 = vcombine.low %v484_v23, %v491_v24  ;;  %v333_v28 = vrot.slane %v326_v26, %v1588_v22  ;;  %v688_v35 = vrot.slane %v677_v32, %v1588_v22  ;;  %v681_v36 = vcombine.high %v677_v32, %v677_v32  ;;  %v286_v39 = vld [vmem:[%s1594_s17] sm:$0xf] }
  0x1e   : > { %v356_v33 = vcombine.high %v348_v30, %v348_v30  ;;  %v355_v34 = vrot.slane %v341_v31, %v1588_v22  ;;  %v477_v47 = vld [vmem:[%s1594_s17] sm:$0x3f] }
  0x1f   : > { %v501_v27 = vrot.slane %v494_v25, %v1588_v22  ;;  %v696_v37 = vcombine.high %v688_v35, %v688_v35  ;;  %v695_v38 = vrot.slane %v681_v36, %v1588_v22  ;;  %v335_v40 = vmul.bf16 %v333_v28, %v286_v39  ;;  %v589_v54 = vld [vmem:[%s1594_s17] sm:$0x3f] }
  0x20   : > { %v846_v1 = vld [vmem:[%s1594_s17] sm:$0x3f] }
  0x21   : > { %502 = vrot.lane.b32.xlu0 %v501_v27, %s1478_s18  ;;  %759 = vrot.lane.b32.xlu1 %v501_v27, %s1479_s19  ;;  %v425_v41 = vrot.slane %v335_v40, %v1588_v22  ;;  %v758_v12 = vld [vmem:[%s1594_s17] sm:$0x3f]  ;;  %s1488_s18 = smov 96   ;;  %s1489_s19 = smov 110  }
  0x22   : > { %v934_v23 = vld [vmem:[%s1594_s17] sm:$0x3f] }
  0x23   : > { %v426_v42 = vcombine.high %v425_v41, %v425_v41  ;;  %v431_v44 = vsel %vm370_vm0, %v425_v41, 0  ;;  %v1103_v40 = vld [vmem:[%s1759_s3] sm:$0xf] }
  0x25   : > { %590 = vrot.lane.b32.xlu0 %v333_v28, %s1480_s20  ;;  %847 = vrot.lane.b32.xlu1 %v333_v28, %s1481_s27  ;;  %v1015_v28 = vld [vmem:[%s1594_s17] sm:$0x3f]  ;;  %s1490_s20 = smov 95   ;;  %s1491_s27 = smov 94  }
  0x26   : > { %1288 = vmatprep.subr.msk.bf16.mxu1 %vm370_vm0, %v426_v42 }
  0x27   : > { %437 = vmatpush1.bf16.msra.mxu1 %v431_v44 }
  0x29   : > { %1016 = vrot.lane.b32.xlu0 %v501_v27, %s1482_s28  ;;  %357 = vrot.lane.b32.xlu1 %v348_v30, %s1483_s30  ;;  %v945_v27 = vrot.slane %v934_v23, %v1588_v22 }
  0x2a   : > { %1289 = vmatmul.mubr.msk.bf16.vlgmr.msra.gmra.mrb[0].mxu1 %vm366_vm2, %v336_v49 }
  0x2b   : > { %666 = vmatprep.mubr.bf16.mxu1 %v1485_v43 }
  0x2d   : > { %359 = vrot.lane.b32.xlu0 %v356_v33, %s1483_s30  ;;  %361 = vrot.lane.b32.xlu1 %v355_v34, %s1483_s30  ;;  %v953_v33 = vcombine.high %v945_v27, %v945_v27  ;;  %v938_v34 = vcombine.high %v934_v23, %v934_v23  ;;  %s1400_s30 = sshll.u32 %s1492_s24, 4  ;;  %s1401_s30 = int_to_ptr.vmem [resolvable:$false] %s1400_s30 }
  0x31   : > { %697 = vrot.lane.b32.xlu0 %v688_v35, %s1484_s8  ;;  %699 = vrot.lane.b32.xlu1 %v696_v37, %s1484_s8  ;;  %v952_v37 = vrot.slane %v938_v34, %v1588_v22 }
  0x35   : > { %701 = vrot.lane.b32.xlu0 %v695_v38, %s1484_s8  ;;  %s1402_s8 = scalar_lea.vmem %s1401_s30, 256 }
  0x93   : > { %v503_v45 = vpop.permute.xlu0 %502  ;;  %v760_v46 = vpop.permute.xlu1 %759 }
  0x94   : > { %v504_v48 = vrot.slane %v503_v45, 6  ;;  %v761_v0 = vrot.slane %v760_v46, 6 }
  0x96   : > { %v506_v50 = vsel %vm505_vm1, %v504_v48, %v503_v45  ;;  %v763_v13 = vsel %vm762_vm6, %v761_v0, %v760_v46 }
  0x97   : > { %v508_v51 = vmul.bf16 %v506_v50, %v477_v47  ;;  %v591_v52 = vpop.permute.xlu0 %590  ;;  %v848_v53 = vpop.permute.xlu1 %847  ;;  %v765_v16 = vmul.bf16 %v763_v13, %v758_v12 }
  0x98   : > { %v592_v55 = vrot.slane %v591_v52, 6  ;;  %v849_v58 = vrot.slane %v848_v53, 6 }
  0x99   : > { %v519_v56 = vrot.slane %v508_v51, %v1588_v22  ;;  %v512_v3 = vcombine.high %v508_v51, %v508_v51  ;;  %v776_v20 = vrot.slane %v765_v16, %v1588_v22  ;;  %v769_v25 = vcombine.high %v765_v16, %v765_v16 }
  0x9a   : > { %v594_v57 = vsel %vm593_vm3, %v592_v55, %v591_v52  ;;  %v851_v2 = vsel %vm850_vm4, %v849_v58, %v848_v53  ;;  %v1293_v52 = vld [vmem:[%s1758_s2 + $0x6] sm:$0x3] }
  0x9b   : > { %v596_v59 = vmul.bf16 %v594_v57, %v589_v54  ;;  %528 = vrot.lane.b32.xlu0 %v519_v56, %s1486_s13  ;;  %v1017_v60 = vpop.permute.xlu0 %1016  ;;  %v358_v61 = vpop.permute.xlu1 %357  ;;  %v853_v9 = vmul.bf16 %v851_v2, %v846_v1  ;;  %v526_v15 = vrot.slane %v512_v3, %v1588_v22  ;;  %v527_v17 = vcombine.high %v519_v56, %v519_v56 }
  0x9c   : > { %v1018_v21 = vrot.slane %v1017_v60, 6  ;;  %v784_v30 = vcombine.high %v776_v20, %v776_v20  ;;  %v783_v32 = vrot.slane %v769_v25, %v1588_v22 }
  0x9d   : > { %v600_v62 = vcombine.high %v596_v59, %v596_v59  ;;  %v607_v63 = vrot.slane %v596_v59, %v1588_v22  ;;  %v864_v18 = vrot.slane %v853_v9, %v1588_v22  ;;  %v857_v19 = vcombine.high %v853_v9, %v853_v9 }
  0x9e   : > { %v1020_v29 = vsel %vm1019_vm7, %v1018_v21, %v1017_v60  ;;  %v1290_v60 = vld [vmem:[%s1758_s2 + $0x4] sm:$0x3] }
  0x9f   : > { %616 = vrot.lane.b32.xlu1 %v607_v63, %s1487_s14  ;;  %v615_v4 = vcombine.high %v607_v63, %v607_v63  ;;  %v360_v5 = vpop.permute.xlu0 %359  ;;  %v362_v6 = vpop.permute.xlu1 %361  ;;  %v614_v10 = vrot.slane %v600_v62, %v1588_v22  ;;  %v871_v24 = vrot.slane %v857_v19, %v1588_v22  ;;  %v872_v26 = vcombine.high %v864_v18, %v864_v18  ;;  %v1305_v19 = vld [vmem:[%s1758_s2 + $0xe] sm:$0x3] }
  0xa0   : > { %v365_v7 = vsel %vm363_vm5, %v360_v5, %v362_v6  ;;  %v364_v8 = vsel %vm363_vm5, %v358_v61, %v360_v5  ;;  %v1022_v31 = vmul.bf16 %v1020_v29, %v1015_v28  ;;  %v1296_v5 = vld [vmem:[%s1758_s2 + $0x8] sm:$0x3] }
  0xa1   : > { %618 = vrot.lane.b32.xlu0 %v615_v4, %s1487_s14  ;;  %1286 = vmatprep.subr.msk.bf16.mxu0 %vm370_vm0, %v365_v7  ;;  %v372_v11 = vsel %vm370_vm0, %v364_v8, 0 }
  0xa2   : > { %378 = vmatpush1.bf16.msra.mxu0 %v372_v11  ;;  %v1033_v35 = vrot.slane %v1022_v31, %v1588_v22  ;;  %v1026_v36 = vcombine.high %v1022_v31, %v1022_v31  ;;  %v1299_v11 = vld [vmem:[%s1758_s2 + $0xa] sm:$0x3] }
  0xa3   : > { %620 = vrot.lane.b32.xlu1 %v614_v10, %s1487_s14  ;;  %v698_v41 = vpop.permute.xlu0 %697  ;;  %v700_v44 = vpop.permute.xlu1 %699 }
  0xa4   : > { %v1040_v38 = vrot.slane %v1026_v36, %v1588_v22  ;;  %v1041_v39 = vcombine.high %v1033_v35, %v1033_v35  ;;  %v704_v58 = vsel %vm703_vm10, %v698_v41, %v700_v44 }
  0xa5   : > { %532 = vrot.lane.b32.xlu0 %v526_v15, %s1486_s13  ;;  %1287 = vmatmul.mubr.msk.bf16.vlgmr.msra.gmra.mrb[0].mxu0 %vm366_vm2, %v1285_v14  ;;  %v710_v62 = vsel %vm370_vm0, %v704_v58, 0  ;;  %v1302_v15 = vld [vmem:[%s1758_s2 + $0xc] sm:$0x3] }
  0xa6   : > { %578 = vmatprep.mubr.bf16.mxu0 %v1485_v43 }
  0xa7   : > { %530 = vrot.lane.b32.xlu1 %v527_v17, %s1486_s13  ;;  %v702_v42 = vpop.permute.xlu0 %701  ;;  %s270_s13 = sand.u32 1, %s1458_s22  }
  0xa8   : > { %v705_v59 = vsel %vm703_vm10, %v700_v44, %v702_v42  ;;  %s1282_s14 = sshll.u32 %s270_s13, 3  ;;  %s1178_s17 = scalar_lea.sflag [#allocation3], %s270_s13 }
  0xa9   : > { %873 = vrot.lane.b32.xlu0 %v864_v18, %s1488_s18  ;;  %s272_s16 = scalar_lea.vmem [#allocation2], %s1282_s14 }
  0xab   : > { %785 = vrot.lane.b32.xlu1 %v776_v20, %s1489_s19 }
  0xad   : > { %877 = vrot.lane.b32.xlu0 %v871_v24, %s1488_s18 }
  0xaf   : > { %875 = vrot.lane.b32.xlu1 %v872_v26, %s1488_s18  ;;  %v1308_v26 = vld [vmem:[%s1758_s2 + $0x10] sm:$0x3]  ;;  %s1194_s18 = sshll.u32 %s272_s16, 4  ;;  %s1711_s18 = int_to_ptr.vmem [resolvable:$true] %s1194_s18 }
  0xb0   : > { %s1396_s28 = scalar_lea.vmem %s1711_s18, 128  ;;  %p1403_p1 = scmp.lt.s32.totalorder %s1711_s18, %s1401_s30 }
  0xb1   : > { %787 = vrot.lane.b32.xlu0 %v784_v30, %s1489_s19  ;;  %p1397_p12 = scmp.ne.s32.totalorder %s1711_s18, %s1396_s28  ;;  %p1404_p2 = scmp.lt.s32.totalorder %s1402_s8, %s1396_s28 }
  0xb3   : > { %789 = vrot.lane.b32.xlu1 %v783_v32, %s1489_s19  ;;  %p1398_p13 = pnand %p1397_p12, %p1568_p4  ;;  %p1405_p3 = por %p1404_p2, %p1403_p1 }
  0xb5   : > { %956 = vrot.lane.b32.xlu0 %v953_v33, %s1490_s20  ;;  %p1399_p0 = pneg %p1398_p13 }
  0xb7   : > { %954 = vrot.lane.b32.xlu1 %v945_v27, %s1490_s20  ;;  %p1406_p5 = pnand %p1405_p3, %p1399_p0 }
  0xb9   : > { %1042 = vrot.lane.b32.xlu0 %v1033_v35, %s1491_s27 }
  0xbb   : > { %958 = vrot.lane.b32.xlu1 %v952_v37, %s1490_s20  ;;  %v1116_v37 = vld [vmem:[%s1761_s5] sm:$0xf] }
  0xbd   : > { %1046 = vrot.lane.b32.xlu0 %v1040_v38, %s1491_s27 }
  0xbf   : > { %1044 = vrot.lane.b32.xlu1 %v1041_v39, %s1491_s27  ;;  %s1709_s27 = scalar_lea.hbm %s1762_s6, %s1318_s15 }
  0xc1   : > { %1119 = vperm.xlu0 %1392, %v1116_v37  }
  0xc3   : > { %1106 = vperm.xlu1 %1391, %v1103_v40  }
  0xfd   : > { %v470_v27 = vpop.f32.mrb[0].mxu1 }
  0xfe   : > { %v472_v28 = vpop.f32.mrb[1].mxu1 }
  0xff   : > { %v474_v29 = vpop.f32.mrb[2].mxu1 }
 0x100   : > { %v475_v30 = vpop.f32.mrb[3].mxu1 }
 0x10d   : > { %v529_v45 = vpop.permute.xlu0 %528 }
 0x111   : > { %v617_v46 = vpop.permute.xlu1 %616 }
 0x113   : > { %v619_v47 = vpop.permute.xlu0 %618 }
 0x114   : > { %v623_v48 = vsel %vm622_vm8, %v617_v46, %v619_v47 }
 0x115   : > { %v621_v49 = vpop.permute.xlu1 %620  ;;  %v629_v22 = vsel %vm370_vm0, %v623_v48, 0 }
 0x116   : > { %v624_v50 = vsel %vm622_vm8, %v619_v47, %v621_v49 }
 0x117   : > { %v533_v51 = vpop.permute.xlu0 %532  ;;  %1294 = vmatprep.subr.msk.bf16.mxu1 %vm370_vm0, %v624_v50 }
 0x118   : > { %635 = vmatpush1.bf16.msra.mxu1 %v629_v22 }
 0x119   : > { %v531_v53 = vpop.permute.xlu1 %530 }
 0x11a   : > { %v535_v54 = vsel %vm534_vm9, %v529_v45, %v531_v53  ;;  %v536_v55 = vsel %vm534_vm9, %v531_v53, %v533_v51 }
 0x11b   : > { %v541_v56 = vsel %vm370_vm0, %v535_v54, 0  ;;  %v874_v57 = vpop.permute.xlu0 %873  ;;  %1291 = vmatprep.subr.msk.bf16.mxu0 %vm370_vm0, %v536_v55  ;;  %1295 = vmatmul.mubr.msk.bf16.vlgmr.msra.gmra.mrb[4].mxu1 %vm366_vm2, %v1293_v52 }
 0x11c   : > { %547 = vmatpush1.bf16.msra.mxu0 %v541_v56  ;;  %835 = vmatprep.mubr.bf16.mxu1 %v1485_v43 }
 0x11d   : > { %1297 = vmatprep.subr.msk.bf16.mxu0 %vm370_vm0, %v705_v59  ;;  %v786_v61 = vpop.permute.xlu1 %785 }
 0x11f   : > { %v878_v63 = vpop.permute.xlu0 %877  ;;  %1292 = vmatmul.mubr.msk.bf16.vlgmr.msra.gmra.mrb[4].mxu0 %vm366_vm2, %v1290_v60 }
 0x120   : > { %716 = vmatpush1.bf16.msra.mxu0 %v710_v62  ;;  %747 = vmatprep.mubr.bf16.mxu0 %v1485_v43 }
 0x121   : > { %v876_v0 = vpop.permute.xlu1 %875 }
 0x122   : > { %v881_v1 = vsel %vm879_vm11, %v876_v0, %v878_v63  ;;  %v880_v3 = vsel %vm879_vm11, %v874_v57, %v876_v0 }
 0x123   : > { %v788_v2 = vpop.permute.xlu0 %787  ;;  %1303 = vmatprep.subr.msk.bf16.mxu0 %vm370_vm0, %v881_v1  ;;  %v886_v8 = vsel %vm370_vm0, %v880_v3, 0 }
 0x124   : > { %v792_v4 = vsel %vm791_vm12, %v786_v61, %v788_v2 }
 0x125   : > { %v790_v6 = vpop.permute.xlu1 %789  ;;  %v798_v9 = vsel %vm370_vm0, %v792_v4, 0 }
 0x126   : > { %v793_v7 = vsel %vm791_vm12, %v788_v2, %v790_v6 }
 0x127   : > { %v957_v10 = vpop.permute.xlu0 %956  ;;  %1298 = vmatmul.mubr.msk.bf16.vlgmr.msra.gmra.mrb[8].mxu0 %vm366_vm2, %v1296_v5  ;;  %1300 = vmatprep.subr.msk.bf16.mxu1 %vm370_vm0, %v793_v7 }
 0x128   : > { %892 = vmatpush1.bf16.msra.mxu0 %v886_v8  ;;  %804 = vmatpush1.bf16.msra.mxu1 %v798_v9 }
 0x129   : > { %v955_v12 = vpop.permute.xlu1 %954  ;;  %923 = vmatprep.mubr.bf16.mxu0 %v1485_v43 }
 0x12a   : > { %v961_v14 = vsel %vm960_vm13, %v955_v12, %v957_v10 }
 0x12b   : > { %v1043_v13 = vpop.permute.xlu0 %1042  ;;  %1301 = vmatmul.mubr.msk.bf16.vlgmr.msra.gmra.mrb[8].mxu1 %vm366_vm2, %v1299_v11  ;;  %v967_v18 = vsel %vm370_vm0, %v961_v14, 0 }
 0x12c   : > { %1004 = vmatprep.mubr.bf16.mxu1 %v1485_v43 }
 0x12d   : > { %v959_v16 = vpop.permute.xlu1 %958 }
 0x12e   : > { %v962_v17 = vsel %vm960_vm13, %v957_v10, %v959_v16 }
 0x12f   : > { %1304 = vmatmul.mubr.msk.bf16.vlgmr.msra.gmra.mrb[12].mxu0 %vm366_vm2, %v1302_v15  ;;  %1306 = vmatprep.subr.msk.bf16.mxu1 %vm370_vm0, %v962_v17  ;;  %v1047_v20 = vpop.permute.xlu0 %1046 }
 0x130   : > { %973 = vmatpush1.bf16.msra.mxu1 %v967_v18  ;;  %1092 = vmatprep.mubr.bf16.mxu0 %v1485_v43 }
 0x131   : > { %v1045_v21 = vpop.permute.xlu1 %1044 }
 0x132   : > { %v1049_v23 = vsel %vm1048_vm14, %v1043_v13, %v1045_v21  ;;  %v1050_v24 = vsel %vm1048_vm14, %v1045_v21, %v1047_v20 }
 0x133   : > { %v1055_v25 = vsel %vm370_vm0, %v1049_v23, 0  ;;  %1307 = vmatmul.mubr.msk.bf16.vlgmr.msra.gmra.mrb[12].mxu1 %vm366_vm2, %v1305_v19  ;;  %1309 = vmatprep.subr.msk.bf16.mxu0 %vm370_vm0, %v1050_v24  ;;  %v1113_v24 = vld [vmem:[%s1760_s4] sm:$0x3] }
 0x134   : > { %1061 = vmatpush1.bf16.msra.mxu0 %v1055_v25  ;;  %1163 = vmatprep.mubr.bf16.mxu1 %v1485_v43 }
 0x137   : > { %1310 = vmatmul.mubr.msk.bf16.vlgmr.msra.gmra.mrb[16].mxu0 %vm366_vm2, %v1308_v26 }
 0x140   : > { %v1120_v25 = vpop.permute.xlu0 %1119 }
 0x142   : > { %v1107_v10 = vpop.permute.xlu1 %1106 }
 0x178   : > { %v411_v31 = vpop.f32.mrb[0].mxu0 }
 0x179   : > { %v413_v32 = vpop.f32.mrb[1].mxu0  ;;  %v471_v33 = vadd.f32 %v470_v27, %v411_v31 }
 0x17a   : > { %v415_v34 = vpop.f32.mrb[2].mxu0  ;;  %v473_v35 = vadd.f32 %v472_v28, %v413_v32 }
 0x17b   : > { %v416_v36 = vpop.f32.mrb[3].mxu0 }
 0x1ee   : > { %v668_v38 = vpop.f32.mrb[4].mxu1 }
 0x1ef   : > { %v670_v39 = vpop.f32.mrb[5].mxu1 }
 0x1f0   : > { %v672_v43 = vpop.f32.mrb[6].mxu1 }
 0x1f1   : > { %v673_v40 = vpop.f32.mrb[7].mxu1 }
 0x1f2   : > { %v580_v41 = vpop.f32.mrb[4].mxu0 }
 0x1f3   : > { %v587_v42 = vadd.f32 %v580_v41, %v471_v33  ;;  %v582_v44 = vpop.f32.mrb[5].mxu0 }
 0x1f4   : > { %v588_v45 = vadd.f32 %v582_v44, %v473_v35  ;;  %v584_v46 = vpop.f32.mrb[6].mxu0 }
 0x1f5   : > { %v675_v47 = vadd.f32 %v668_v38, %v587_v42  ;;  %v585_v48 = vpop.f32.mrb[7].mxu0 }
 0x1f6   : > { %v676_v49 = vadd.f32 %v670_v39, %v588_v45 }
 0x1fa   : > { %v749_v50 = vpop.f32.mrb[8].mxu0 }
 0x1fb   : > { %v756_v22 = vadd.f32 %v749_v50, %v675_v47  ;;  %v751_v51 = vpop.f32.mrb[9].mxu0 }
 0x1fc   : > { %v757_v52 = vadd.f32 %v751_v51, %v676_v49  ;;  %v753_v53 = vpop.f32.mrb[10].mxu0 }
 0x1fd   : > { %v754_v54 = vpop.f32.mrb[11].mxu0 }
 0x1fe   : > { %v837_v55 = vpop.f32.mrb[8].mxu1 }
 0x1ff   : > { %v844_v56 = vadd.f32 %v837_v55, %v756_v22  ;;  %v839_v57 = vpop.f32.mrb[9].mxu1 }
 0x200   : > { %v845_v58 = vadd.f32 %v839_v57, %v757_v52  ;;  %v841_v59 = vpop.f32.mrb[10].mxu1 }
 0x201   : > { %v842_v60 = vpop.f32.mrb[11].mxu1 }
 0x202   : > { %v925_v61 = vpop.f32.mrb[12].mxu0 }
 0x203   : > { %v932_v62 = vadd.f32 %v925_v61, %v844_v56  ;;  %v927_v63 = vpop.f32.mrb[13].mxu0 }
 0x204   : > { %v933_v0 = vadd.f32 %v927_v63, %v845_v58  ;;  %v929_v1 = vpop.f32.mrb[14].mxu0 }
 0x205   : > { %v930_v2 = vpop.f32.mrb[15].mxu0 }
 0x206   : > { %v1006_v3 = vpop.f32.mrb[12].mxu1 }
 0x207   : > { %v1013_v4 = vadd.f32 %v1006_v3, %v932_v62  ;;  %v1008_v5 = vpop.f32.mrb[13].mxu1 }
 0x208   : > { %v1014_v6 = vadd.f32 %v1008_v5, %v933_v0  ;;  %v1010_v7 = vpop.f32.mrb[14].mxu1 }
 0x209   : > { %v1011_v8 = vpop.f32.mrb[15].mxu1 }
 0x20a   : > { %v1094_v9 = vpop.f32.mrb[16].mxu0 }
 0x20b   : > { %v1101_v11 = vadd.f32 %v1094_v9, %v1013_v4  ;;  %v1096_v12 = vpop.f32.mrb[17].mxu0 }
 0x20c   : > { %v1102_v13 = vadd.f32 %v1096_v12, %v1014_v6  ;;  %v1098_v14 = vpop.f32.mrb[18].mxu0 }
 0x20d   : > { %v1109_v15 = vadd.f32 %v1107_v10, %v1101_v11  ;;  %v1099_v16 = vpop.f32.mrb[19].mxu0 }
 0x20e   : > { %v1110_v17 = vadd.f32 %v1107_v10, %v1102_v13 }
 0x20f   : > { %v1111_v18 = vmax.f32 %v1109_v15, 0.0 }
 0x210   : > { %v1112_v19 = vmax.f32 %v1110_v17, 0.0 }
 0x211   : > { %v1114_v20 = vpack.c.bf16 %v1111_v18, %v1111_v18 }
 0x212   : > { %v1115_v21 = vpack.c.bf16 %v1112_v19, %v1112_v19 }
 0x213   : > { %v1126_v23 = vsel %vm370_vm0, %v1114_v20, 0 }
 0x214   : > { %1311 = vmatprep.subr.msk.bf16.mxu1 %vm370_vm0, %v1115_v21 }
 0x215   : > { %1132 = vmatpush1.bf16.msra.mxu1 %v1126_v23 }
 0x218   : > { %1312 = vmatmul.mubr.msk.bf16.vlgmr.msra.gmra.mrb[16].mxu1 %vm366_vm2, %v1113_v24 }
 0x2eb   : > { %v1165_v26 = vpop.f32.mrb[16].mxu1 }
 0x2ec   : > { %v1167_v27 = vpop.f32.mrb[17].mxu1  ;;  %v1166_v28 = vadd.f32 %v1165_v26, %v1120_v25 }
 0x2ed   : > { %v1169_v29 = vpop.f32.mrb[18].mxu1  ;;  %v1168_v30 = vadd.f32 %v1167_v27, %v1120_v25 }
 0x2ee   : > { %v1170_v31 = vpop.f32.mrb[19].mxu1 }
 0x2ef   : > { %v1174_v32 = vcombine.low %v1166_v28, %v1168_v30 }
 0x2f1   : > { %1176 = vst [vmem:[%s272_s16] sm:$0xff] %v1174_v32 }
 0x2f2   : > { %1409 = shalt.err (!%p1406_p5)
}
 0x2f3   : > { %s1410_s11 = scalar_lea.hbm %s1709_s27, 128  ;;  %s1414_s14 = scalar_lea.hbm %s1762_s6, 256 }
 0x2f4   : > { %p1411_p6 = scmp.ne.s32.totalorder %s1709_s27, %s1410_s11  ;;  %p1415_p10 = scmp.lt.u32.totalorder %s1709_s27, %s1762_s6 }
 0x2f5   : > { %p1416_p11 = scmp.lt.u32.totalorder %s1414_s14, %s1410_s11  ;;  %p1418_p13 = scmp.lt.u32.totalorder %s1410_s11, %s1709_s27 }
 0x2f6   : > { %p1412_p7 = pnand %p1411_p6, %p1568_p4 }
 0x2f7   : > { %p1417_p12 = por %p1416_p11, %p1415_p10 }
 0x2f8   : > { %p1413_p9 = pneg %p1412_p7 }
 0x2f9   : > { %p1419_p0 = por %p1418_p13, %p1417_p12 }
 0x2fb   : > { %p1420_p1 = pnand %p1419_p0, %p1413_p9 }
 0x2fd   : > { %1423 = shalt.err (!%p1420_p1)
}
 0x2fe   : > { %1320 = dma.vmem_to_hbm [thread:$0]  (%p1568_p4), %s1711_s18, 128, %s1709_s27, %s1178_s17  }
 0x2ff PF: > { %p1326_p2 = scmp.ge.s32.totalorder %s1474_s26, 2  ;;  %s1206_s19 = sand.u32 1, %s1454_s21  }
 0x300   : > { %s1207_s20 = scalar_lea.sflag [#allocation3], %s1206_s19 }
 0x301   : > { %p1323_p3 = pnand %p1326_p2, %p1575_p8 }
 0x303   : > { %1449 = dma.done.wait (!%p1323_p3), %s1207_s20, 128  }
 0x304   : > { %1451 = vsyncadd (!%p1323_p3), %s1207_s20, 4294967168  ;;  %s19_s26 = sadd.s32 1, %s1474_s26   ;;  %s1765_s21 = smov %s1458_s22 }
 0x305   : > { %p16_p5 = scmp.ge.s32.totalorder %s19_s26, 4   ;;  %s1766_s22 = smov %s1462_s23 }
 0x306   : > { %s1767_s23 = smov %s1581_s10  ;;  %s1768_s24 = smov %s1470_s25 }
 0x307   : > { %s1769_s25 = smov %s1771_s29  ;;  %18 = sbr.rel (!%p16_p5) target bundleno = 4 (0x4), region = 90 }
 0x30e   :  { %1212 = vsyncpa [#allocation3], 1 }
 0x30f   :  { %1214 = vsyncpa [#allocation3 + $0x1], 1 }

// kernel: tpu_custom_call.1
= control target key start
LH: loop header
LB: loop body
LE: loop exit
PB: predicated region body
PF: predicated region fallthrough
CT: control target
= control target key end

     0   :  { %11 = vsyncpa [#allocation3], 0  ;;  %s1756_s0 = inlined_call_operand.vmem [shape: bf16[2,4,290], index: 0, kind: input, shape index: {}]   ;;  %s1757_s1 = inlined_call_operand.vmem [shape: bf16[2,256], index: 1, kind: input, shape index: {}]   ;;  %s1758_s2 = inlined_call_operand.vmem [shape: bf16[9,4,4], index: 2, kind: input, shape index: {}]   ;;  %s1759_s3 = inlined_call_operand.vmem [shape: f32[4,1], index: 3, kind: input, shape index: {}]   ;;  %s1760_s4 = inlined_call_operand.vmem [shape: bf16[4,4], index: 4, kind: input, shape index: {}]   ;;  %s1761_s5 = inlined_call_operand.vmem [shape: f32[4,1], index: 5, kind: input, shape index: {}]   ;;  %s1762_s6 = inlined_call_operand.hbm [shape: f32[2,4,256], index: 6, kind: output, shape index: {}]  }
   0x1   :  { %13 = vsyncpa [#allocation3 + $0x1], 0  ;;  %s1528_s21 = smov 0   ;;  %s1530_s22 = smov 0  }
   0x2   :  { %s1532_s23 = smov 0   ;;  %s1534_s24 = smov 0  }
   0x3   :  { %s1536_s25 = smov 0   ;;  %s1538_s26 = smov 0  }
   0x4 LB: > { %s1276_s27 = sadd.s32 4294967295, %s1474_s26   ;;  %s1277_s28 = sadd.s32 4294967294, %s1474_s26   ;;  %s1474_s26 = sphi %s1538_s26, %s19_s26   ;;  %s1470_s25 = sphi %s1536_s25, %s1769_s25   ;;  %s1466_s24 = sphi %s1534_s24, %s1768_s24   ;;  %s1462_s23 = sphi %s1532_s23, %s1767_s23   ;;  %s1458_s22 = sphi %s1530_s22, %s1766_s22   ;;  %s1454_s21 = sphi %s1528_s21, %s1765_s21  }
   0x5   : > { %s31_s29 = sadd.s32 1, %s1470_s25  ;;  %s176_s30 = sadd.s32 1, %s1462_s23 }
   0x6   : > { %p33_p0 = scmp.ge.s32.totalorder %s31_s29, 2  ;;  %p186_p1 = scmp.ne.s32.totalorder %s1462_s23, %s1458_s22 }
   0x7   : > { %p187_p2 = scmp.eq.s32.totalorder %s1276_s27, 1  ;;  %p192_p3 = scmp.ne.s32.totalorder %s1458_s22, %s1454_s21 }
   0x8   : > { %s1771_s29 = smov (%p33_p0, %s31_s29), 0  ;;  %p193_p5 = scmp.eq.s32.totalorder %s1277_s28, 1 }
   0x9   : > { %p1568_p4 = por %p187_p2, %p186_p1  ;;  %s171_s8 = ssub.s32 %s1470_s25, %s1771_s29 }
   0xa   : > { %p1281_p6 = scmp.ge.s32.totalorder %s1474_s26, 1  ;;  %p174_p7 = scmp.eq.s32.totalorder %s171_s8, 0 }
   0xb   : > { %p1575_p8 = por %p193_p5, %p192_p3  ;;  %p239_p9 = scmp.lt.s32.totalorder %s1474_s26, 3 }
   0xc   : > { %s1581_s10 = scalar_select %p174_p7, %s1462_s23, %s176_s30  }
   0xd   : > { %p240_p10 = pnand %p1281_p6, %p239_p9 }
   0xe   : > { %v1284_v0 = vld.sshfl [vmem:[%s1757_s1] sm:$0x11 pattern:$0x75316420] (!%p240_p10)  ;;  %v299_v1 = vlaneseq (!%p240_p10)  ;;  %v1476_v2 = vmov (!%p240_p10), 1966171168  }
   0xf   : > { %243 = sbr.rel (%p240_p10) target bundleno = 767 (0x2ff), region = 44  ;;  %v297_v3 = vunpack.c.l.s4 (!%p240_p10), %v1476_v2  ;;  %v295_v5 = vcombine.high (!%p240_p10), %v1284_v0, %v1284_v0  ;;  %v1477_v7 = vmov (!%p240_p10), 1983009808   ;;  %p273_p11 = scmp.lt.s32.totalorder (!%p240_p10), %s1466_s24, 1  ;;  %vm370_vm0 = vcmask (!%p240_p10), 1041408  }
  0x10   : > { %v300_v4 = vshrl.u32 (!%p240_p10), %v299_v1, 7  ;;  %v328_v8 = vunpack.c.l.s4 (!%p240_p10), %v1477_v7  ;;  %s1478_s18 = smov (!%p240_p10), 2   ;;  %s1479_s19 = smov (!%p240_p10), 18   ;;  %v1485_v43 = vmov (!%p240_p10), 0   ;;  %vm505_vm1 = vcmask (!%p240_p10), 15360  }
  0x11   : > { %v298_v6 = vunpack.c.0.s8 (!%p240_p10), %v297_v3  ;;  %s1480_s20 = smov (!%p240_p10), 16   ;;  %s1481_s27 = smov (!%p240_p10), 32   ;;  %409 = vmatprep.mubr.bf16.mxu0 (!%p240_p10), %v1485_v43  ;;  %468 = vmatprep.mubr.bf16.mxu1 (!%p240_p10), %v1485_v43  ;;  %vm366_vm2 = vcmask (!%p240_p10), 31744   ;;  %v336_v49 = vld [vmem:[%s1758_s2] sm:$0x3] (!%p240_p10)  ;;  %vm593_vm3 = vcmask (!%p240_p10), 130048  }
  0x12   : > { %v315_v12 = vsub.s32 (!%p240_p10), 0, %v300_v4  ;;  %v329_v13 = vunpack.c.0.s8 (!%p240_p10), %v328_v8  ;;  %s1482_s28 = smov (!%p240_p10), 34   ;;  %s1483_s30 = smov (!%p240_p10), 127   ;;  %1391 = vset.pattern.permute.xlu1 (!%p240_p10), %v1485_v43  ;;  %1392 = vset.pattern.permute.xlu0 (!%p240_p10), %v1485_v43  ;;  %vm850_vm4 = vcmask (!%p240_p10), 261120   ;;  %vm363_vm5 = vcmask (!%p240_p10), 1039360  }
  0x13   : > { %v301_v9 = vsub.s32 (!%p240_p10), %v298_v6, %v300_v4  ;;  %s1484_s8 = smov (!%p240_p10), 111   ;;  %vm762_vm6 = vcmask (!%p240_p10), 146432   ;;  %vm1019_vm7 = vcmask (!%p240_p10), 277504   ;;  %vm622_vm8 = vcmask (!%p240_p10), 916480   ;;  %s1318_s15 = sshll.u32 (!%p240_p10), %s1466_s24, 7 }
  0x14   : > { %v1588_v22 = vsub.s32 (!%p240_p10), %v329_v13, %v300_v4  ;;  %vm534_vm9 = vcmask (!%p240_p10), 1031168   ;;  %vm703_vm10 = vcmask (!%p240_p10), 908288   ;;  %vm879_vm11 = vcmask (!%p240_p10), 785408  }
  0x15   : > { %v302_v10 = vrot.slane (!%p240_p10), %v1284_v0, %v301_v9  ;;  %v309_v11 = vrot.slane (!%p240_p10), %v295_v5, %v301_v9  ;;  %vm791_vm12 = vcmask (!%p240_p10), 900096   ;;  %vm960_vm13 = vcmask (!%p240_p10), 777216  }
  0x16   : > { %s274_s13 = scalar_select %p273_p11, %s1466_s24, 1  ;;  %vm1048_vm14 = vcmask 769024  }
  0x17   : > { %v478_v14 = vshrl.u32 %v302_v10, 16  ;;  %v485_v15 = vshrl.u32 %v309_v11, 16  ;;  %v311_v16 = vpack.i.b16 %v302_v10, %v302_v10  ;;  %v318_v17 = vpack.i.b16 %v309_v11, %v309_v11  ;;  %s1492_s24 = smov [#allocation2]  }
  0x18   : > { %s1319_s14 = smul.u32 6, %s274_s13  ;;  %s1486_s13 = smov 126  }
  0x19   : > { %v479_v18 = vpack.i.b16 %v478_v14, %v478_v14  ;;  %v486_v19 = vpack.i.b16 %v485_v15, %v485_v15  ;;  %v316_v20 = vrot.slane %v311_v16, %v315_v12  ;;  %v323_v21 = vrot.slane %v318_v17, %v315_v12  ;;  %v1285_v14 = vld [vmem:[%s1758_s2 + $0x2] sm:$0x3] }
  0x1a   : > { %s1594_s17 = scalar_lea.vmem %s1756_s0, %s1319_s14  ;;  %s1487_s14 = smov 112  }
  0x1b   : > { %v484_v23 = vrot.slane %v479_v18, %v315_v12  ;;  %v491_v24 = vrot.slane %v486_v19, %v315_v12  ;;  %v326_v26 = vcombine.low %v316_v20, %v323_v21  ;;  %v337_v29 = vld [vmem:[%s1594_s17] sm:$0x3f] }
  0x1c   : > { %v348_v30 = vrot.slane %v337_v29, %v1588_v22  ;;  %v341_v31 = vcombine.high %v337_v29, %v337_v29  ;;  %v677_v32 = vld [vmem:[%s1594_s17] sm:$0x3f] }
  0x1d   : > { %v494_v25 = vcombine.low %v484_v23, %v491_v24  ;;  %v333_v28 = vrot.slane %v326_v26, %v1588_v22  ;;  %v688_v35 = vrot.slane %v677_v32, %v1588_v22  ;;  %v681_v36 = vcombine.high %v677_v32, %v677_v32  ;;  %v286_v39 = vld [vmem:[%s1594_s17] sm:$0xf] }
  0x1e   : > { %v356_v33 = vcombine.high %v348_v30, %v348_v30  ;;  %v355_v34 = vrot.slane %v341_v31, %v1588_v22  ;;  %v477_v47 = vld [vmem:[%s1594_s17] sm:$0x3f] }
  0x1f   : > { %v501_v27 = vrot.slane %v494_v25, %v1588_v22  ;;  %v696_v37 = vcombine.high %v688_v35, %v688_v35  ;;  %v695_v38 = vrot.slane %v681_v36, %v1588_v22  ;;  %v335_v40 = vmul.bf16 %v333_v28, %v286_v39  ;;  %v589_v54 = vld [vmem:[%s1594_s17] sm:$0x3f] }
  0x20   : > { %v846_v1 = vld [vmem:[%s1594_s17] sm:$0x3f] }
  0x21   : > { %502 = vrot.lane.b32.xlu0 %v501_v27, %s1478_s18  ;;  %759 = vrot.lane.b32.xlu1 %v501_v27, %s1479_s19  ;;  %v425_v41 = vrot.slane %v335_v40, %v1588_v22  ;;  %v758_v12 = vld [vmem:[%s1594_s17] sm:$0x3f]  ;;  %s1488_s18 = smov 96   ;;  %s1489_s19 = smov 110  }
  0x22   : > { %v934_v23 = vld [vmem:[%s1594_s17] sm:$0x3f] }
  0x23   : > { %v426_v42 = vcombine.high %v425_v41, %v425_v41  ;;  %v431_v44 = vsel %vm370_vm0, %v425_v41, 0  ;;  %v1103_v40 = vld [vmem:[%s1759_s3] sm:$0xf] }
  0x25   : > { %590 = vrot.lane.b32.xlu0 %v333_v28, %s1480_s20  ;;  %847 = vrot.lane.b32.xlu1 %v333_v28, %s1481_s27  ;;  %v1015_v28 = vld [vmem:[%s1594_s17] sm:$0x3f]  ;;  %s1490_s20 = smov 95   ;;  %s1491_s27 = smov 94  }
  0x26   : > { %1288 = vmatprep.subr.msk.bf16.mxu1 %vm370_vm0, %v426_v42 }
  0x27   : > { %437 = vmatpush1.bf16.msra.mxu1 %v431_v44 }
  0x29   : > { %1016 = vrot.lane.b32.xlu0 %v501_v27, %s1482_s28  ;;  %357 = vrot.lane.b32.xlu1 %v348_v30, %s1483_s30  ;;  %v945_v27 = vrot.slane %v934_v23, %v1588_v22 }
  0x2a   : > { %1289 = vmatmul.mubr.msk.bf16.vlgmr.msra.gmra.mrb[0].mxu1 %vm366_vm2, %v336_v49 }
  0x2b   : > { %666 = vmatprep.mubr.bf16.mxu1 %v1485_v43 }
  0x2d   : > { %359 = vrot.lane.b32.xlu0 %v356_v33, %s1483_s30  ;;  %361 = vrot.lane.b32.xlu1 %v355_v34, %s1483_s30  ;;  %v953_v33 = vcombine.high %v945_v27, %v945_v27  ;;  %v938_v34 = vcombine.high %v934_v23, %v934_v23  ;;  %s1400_s30 = sshll.u32 %s1492_s24, 4  ;;  %s1401_s30 = int_to_ptr.vmem [resolvable:$false] %s1400_s30 }
  0x31   : > { %697 = vrot.lane.b32.xlu0 %v688_v35, %s1484_s8  ;;  %699 = vrot.lane.b32.xlu1 %v696_v37, %s1484_s8  ;;  %v952_v37 = vrot.slane %v938_v34, %v1588_v22 }
  0x35   : > { %701 = vrot.lane.b32.xlu0 %v695_v38, %s1484_s8  ;;  %s1402_s8 = scalar_lea.vmem %s1401_s30, 256 }
  0x93   : > { %v503_v45 = vpop.permute.xlu0 %502  ;;  %v760_v46 = vpop.permute.xlu1 %759 }
  0x94   : > { %v504_v48 = vrot.slane %v503_v45, 6  ;;  %v761_v0 = vrot.slane %v760_v46, 6 }
  0x96   : > { %v506_v50 = vsel %vm505_vm1, %v504_v48, %v503_v45  ;;  %v763_v13 = vsel %vm762_vm6, %v761_v0, %v760_v46 }
  0x97   : > { %v508_v51 = vmul.bf16 %v506_v50, %v477_v47  ;;  %v591_v52 = vpop.permute.xlu0 %590  ;;  %v848_v53 = vpop.permute.xlu1 %847  ;;  %v765_v16 = vmul.bf16 %v763_v13, %v758_v12 }
  0x98   : > { %v592_v55 = vrot.slane %v591_v52, 6  ;;  %v849_v58 = vrot.slane %v848_v53, 6 }
  0x99   : > { %v519_v56 = vrot.slane %v508_v51, %v1588_v22  ;;  %v512_v3 = vcombine.high %v508_v51, %v508_v51  ;;  %v776_v20 = vrot.slane %v765_v16, %v1588_v22  ;;  %v769_v25 = vcombine.high %v765_v16, %v765_v16 }
  0x9a   : > { %v594_v57 = vsel %vm593_vm3, %v592_v55, %v591_v52  ;;  %v851_v2 = vsel %vm850_vm4, %v849_v58, %v848_v53  ;;  %v1293_v52 = vld [vmem:[%s1758_s2 + $0x6] sm:$0x3] }
  0x9b   : > { %v596_v59 = vmul.bf16 %v594_v57, %v589_v54  ;;  %528 = vrot.lane.b32.xlu0 %v519_v56, %s1486_s13  ;;  %v1017_v60 = vpop.permute.xlu0 %1016  ;;  %v358_v61 = vpop.permute.xlu1 %357  ;;  %v853_v9 = vmul.bf16 %v851_v2, %v846_v1  ;;  %v526_v15 = vrot.slane %v512_v3, %v1588_v22  ;;  %v527_v17 = vcombine.high %v519_v56, %v519_v56 }
  0x9c   : > { %v1018_v21 = vrot.slane %v1017_v60, 6  ;;  %v784_v30 = vcombine.high %v776_v20, %v776_v20  ;;  %v783_v32 = vrot.slane %v769_v25, %v1588_v22 }
  0x9d   : > { %v600_v62 = vcombine.high %v596_v59, %v596_v59  ;;  %v607_v63 = vrot.slane %v596_v59, %v1588_v22  ;;  %v864_v18 = vrot.slane %v853_v9, %v1588_v22  ;;  %v857_v19 = vcombine.high %v853_v9, %v853_v9 }
  0x9e   : > { %v1020_v29 = vsel %vm1019_vm7, %v1018_v21, %v1017_v60  ;;  %v1290_v60 = vld [vmem:[%s1758_s2 + $0x4] sm:$0x3] }
  0x9f   : > { %616 = vrot.lane.b32.xlu1 %v607_v63, %s1487_s14  ;;  %v615_v4 = vcombine.high %v607_v63, %v607_v63  ;;  %v360_v5 = vpop.permute.xlu0 %359  ;;  %v362_v6 = vpop.permute.xlu1 %361  ;;  %v614_v10 = vrot.slane %v600_v62, %v1588_v22  ;;  %v871_v24 = vrot.slane %v857_v19, %v1588_v22  ;;  %v872_v26 = vcombine.high %v864_v18, %v864_v18  ;;  %v1305_v19 = vld [vmem:[%s1758_s2 + $0xe] sm:$0x3] }
  0xa0   : > { %v365_v7 = vsel %vm363_vm5, %v360_v5, %v362_v6  ;;  %v364_v8 = vsel %vm363_vm5, %v358_v61, %v360_v5  ;;  %v1022_v31 = vmul.bf16 %v1020_v29, %v1015_v28  ;;  %v1296_v5 = vld [vmem:[%s1758_s2 + $0x8] sm:$0x3] }
  0xa1   : > { %618 = vrot.lane.b32.xlu0 %v615_v4, %s1487_s14  ;;  %1286 = vmatprep.subr.msk.bf16.mxu0 %vm370_vm0, %v365_v7  ;;  %v372_v11 = vsel %vm370_vm0, %v364_v8, 0 }
  0xa2   : > { %378 = vmatpush1.bf16.msra.mxu0 %v372_v11  ;;  %v1033_v35 = vrot.slane %v1022_v31, %v1588_v22  ;;  %v1026_v36 = vcombine.high %v1022_v31, %v1022_v31  ;;  %v1299_v11 = vld [vmem:[%s1758_s2 + $0xa] sm:$0x3] }
  0xa3   : > { %620 = vrot.lane.b32.xlu1 %v614_v10, %s1487_s14  ;;  %v698_v41 = vpop.permute.xlu0 %697  ;;  %v700_v44 = vpop.permute.xlu1 %699 }
  0xa4   : > { %v1040_v38 = vrot.slane %v1026_v36, %v1588_v22  ;;  %v1041_v39 = vcombine.high %v1033_v35, %v1033_v35  ;;  %v704_v58 = vsel %vm703_vm10, %v698_v41, %v700_v44 }
  0xa5   : > { %532 = vrot.lane.b32.xlu0 %v526_v15, %s1486_s13  ;;  %1287 = vmatmul.mubr.msk.bf16.vlgmr.msra.gmra.mrb[0].mxu0 %vm366_vm2, %v1285_v14  ;;  %v710_v62 = vsel %vm370_vm0, %v704_v58, 0  ;;  %v1302_v15 = vld [vmem:[%s1758_s2 + $0xc] sm:$0x3] }
  0xa6   : > { %578 = vmatprep.mubr.bf16.mxu0 %v1485_v43 }
  0xa7   : > { %530 = vrot.lane.b32.xlu1 %v527_v17, %s1486_s13  ;;  %v702_v42 = vpop.permute.xlu0 %701  ;;  %s270_s13 = sand.u32 1, %s1458_s22  }
  0xa8   : > { %v705_v59 = vsel %vm703_vm10, %v700_v44, %v702_v42  ;;  %s1282_s14 = sshll.u32 %s270_s13, 3  ;;  %s1178_s17 = scalar_lea.sflag [#allocation3], %s270_s13 }
  0xa9   : > { %873 = vrot.lane.b32.xlu0 %v864_v18, %s1488_s18  ;;  %s272_s16 = scalar_lea.vmem [#allocation2], %s1282_s14 }
  0xab   : > { %785 = vrot.lane.b32.xlu1 %v776_v20, %s1489_s19 }
  0xad   : > { %877 = vrot.lane.b32.xlu0 %v871_v24, %s1488_s18 }
  0xaf   : > { %875 = vrot.lane.b32.xlu1 %v872_v26, %s1488_s18  ;;  %v1308_v26 = vld [vmem:[%s1758_s2 + $0x10] sm:$0x3]  ;;  %s1194_s18 = sshll.u32 %s272_s16, 4  ;;  %s1711_s18 = int_to_ptr.vmem [resolvable:$true] %s1194_s18 }
  0xb0   : > { %s1396_s28 = scalar_lea.vmem %s1711_s18, 128  ;;  %p1403_p1 = scmp.lt.s32.totalorder %s1711_s18, %s1401_s30 }
  0xb1   : > { %787 = vrot.lane.b32.xlu0 %v784_v30, %s1489_s19  ;;  %p1397_p12 = scmp.ne.s32.totalorder %s1711_s18, %s1396_s28  ;;  %p1404_p2 = scmp.lt.s32.totalorder %s1402_s8, %s1396_s28 }
  0xb3   : > { %789 = vrot.lane.b32.xlu1 %v783_v32, %s1489_s19  ;;  %p1398_p13 = pnand %p1397_p12, %p1568_p4  ;;  %p1405_p3 = por %p1404_p2, %p1403_p1 }
  0xb5   : > { %956 = vrot.lane.b32.xlu0 %v953_v33, %s1490_s20  ;;  %p1399_p0 = pneg %p1398_p13 }
  0xb7   : > { %954 = vrot.lane.b32.xlu1 %v945_v27, %s1490_s20  ;;  %p1406_p5 = pnand %p1405_p3, %p1399_p0 }
  0xb9   : > { %1042 = vrot.lane.b32.xlu0 %v1033_v35, %s1491_s27 }
  0xbb   : > { %958 = vrot.lane.b32.xlu1 %v952_v37, %s1490_s20  ;;  %v1116_v37 = vld [vmem:[%s1761_s5] sm:$0xf] }
  0xbd   : > { %1046 = vrot.lane.b32.xlu0 %v1040_v38, %s1491_s27 }
  0xbf   : > { %1044 = vrot.lane.b32.xlu1 %v1041_v39, %s1491_s27  ;;  %s1709_s27 = scalar_lea.hbm %s1762_s6, %s1318_s15 }
  0xc1   : > { %1119 = vperm.xlu0 %1392, %v1116_v37  }
  0xc3   : > { %1106 = vperm.xlu1 %1391, %v1103_v40  }
  0xfd   : > { %v470_v27 = vpop.f32.mrb[0].mxu1 }
  0xfe   : > { %v472_v28 = vpop.f32.mrb[1].mxu1 }
  0xff   : > { %v474_v29 = vpop.f32.mrb[2].mxu1 }
 0x100   : > { %v475_v30 = vpop.f32.mrb[3].mxu1 }
 0x10d   : > { %v529_v45 = vpop.permute.xlu0 %528 }
 0x111   : > { %v617_v46 = vpop.permute.xlu1 %616 }
 0x113   : > { %v619_v47 = vpop.permute.xlu0 %618 }
 0x114   : > { %v623_v48 = vsel %vm622_vm8, %v617_v46, %v619_v47 }
 0x115   : > { %v621_v49 = vpop.permute.xlu1 %620  ;;  %v629_v22 = vsel %vm370_vm0, %v623_v48, 0 }
 0x116   : > { %v624_v50 = vsel %vm622_vm8, %v619_v47, %v621_v49 }
 0x117   : > { %v533_v51 = vpop.permute.xlu0 %532  ;;  %1294 = vmatprep.subr.msk.bf16.mxu1 %vm370_vm0, %v624_v50 }
 0x118   : > { %635 = vmatpush1.bf16.msra.mxu1 %v629_v22 }
 0x119   : > { %v531_v53 = vpop.permute.xlu1 %530 }
 0x11a   : > { %v535_v54 = vsel %vm534_vm9, %v529_v45, %v531_v53  ;;  %v536_v55 = vsel %vm534_vm9, %v531_v53, %v533_v51 }
 0x11b   : > { %v541_v56 = vsel %vm370_vm0, %v535_v54, 0  ;;  %v874_v57 = vpop.permute.xlu0 %873  ;;  %1291 = vmatprep.subr.msk.bf16.mxu0 %vm370_vm0, %v536_v55  ;;  %1295 = vmatmul.mubr.msk.bf16.vlgmr.msra.gmra.mrb[4].mxu1 %vm366_vm2, %v1293_v52 }
 0x11c   : > { %547 = vmatpush1.bf16.msra.mxu0 %v541_v56  ;;  %835 = vmatprep.mubr.bf16.mxu1 %v1485_v43 }
 0x11d   : > { %1297 = vmatprep.subr.msk.bf16.mxu0 %vm370_vm0, %v705_v59  ;;  %v786_v61 = vpop.permute.xlu1 %785 }
 0x11f   : > { %v878_v63 = vpop.permute.xlu0 %877  ;;  %1292 = vmatmul.mubr.msk.bf16.vlgmr.msra.gmra.mrb[4].mxu0 %vm366_vm2, %v1290_v60 }
 0x120   : > { %716 = vmatpush1.bf16.msra.mxu0 %v710_v62  ;;  %747 = vmatprep.mubr.bf16.mxu0 %v1485_v43 }
 0x121   : > { %v876_v0 = vpop.permute.xlu1 %875 }
 0x122   : > { %v881_v1 = vsel %vm879_vm11, %v876_v0, %v878_v63  ;;  %v880_v3 = vsel %vm879_vm11, %v874_v57, %v876_v0 }
 0x123   : > { %v788_v2 = vpop.permute.xlu0 %787  ;;  %1303 = vmatprep.subr.msk.bf16.mxu0 %vm370_vm0, %v881_v1  ;;  %v886_v8 = vsel %vm370_vm0, %v880_v3, 0 }
 0x124   : > { %v792_v4 = vsel %vm791_vm12, %v786_v61, %v788_v2 }
 0x125   : > { %v790_v6 = vpop.permute.xlu1 %789  ;;  %v798_v9 = vsel %vm370_vm0, %v792_v4, 0 }
 0x126   : > { %v793_v7 = vsel %vm791_vm12, %v788_v2, %v790_v6 }
 0x127   : > { %v957_v10 = vpop.permute.xlu0 %956  ;;  %1298 = vmatmul.mubr.msk.bf16.vlgmr.msra.gmra.mrb[8].mxu0 %vm366_vm2, %v1296_v5  ;;  %1300 = vmatprep.subr.msk.bf16.mxu1 %vm370_vm0, %v793_v7 }
 0x128   : > { %892 = vmatpush1.bf16.msra.mxu0 %v886_v8  ;;  %804 = vmatpush1.bf16.msra.mxu1 %v798_v9 }
 0x129   : > { %v955_v12 = vpop.permute.xlu1 %954  ;;  %923 = vmatprep.mubr.bf16.mxu0 %v1485_v43 }
 0x12a   : > { %v961_v14 = vsel %vm960_vm13, %v955_v12, %v957_v10 }
 0x12b   : > { %v1043_v13 = vpop.permute.xlu0 %1042  ;;  %1301 = vmatmul.mubr.msk.bf16.vlgmr.msra.gmra.mrb[8].mxu1 %vm366_vm2, %v1299_v11  ;;  %v967_v18 = vsel %vm370_vm0, %v961_v14, 0 }
 0x12c   : > { %1004 = vmatprep.mubr.bf16.mxu1 %v1485_v43 }
 0x12d   : > { %v959_v16 = vpop.permute.xlu1 %958 }
 0x12e   : > { %v962_v17 = vsel %vm960_vm13, %v957_v10, %v959_v16 }
 0x12f   : > { %1304 = vmatmul.mubr.msk.bf16.vlgmr.msra.gmra.mrb[12].mxu0 %vm366_vm2, %v1302_v15  ;;  %1306 = vmatprep.subr.msk.bf16.mxu1 %vm370_vm0, %v962_v17  ;;  %v1047_v20 = vpop.permute.xlu0 %1046 }
 0x130   : > { %973 = vmatpush1.bf16.msra.mxu1 %v967_v18  ;;  %1092 = vmatprep.mubr.bf16.mxu0 %v1485_v43 }
 0x131   : > { %v1045_v21 = vpop.permute.xlu1 %1044 }
 0x132   : > { %v1049_v23 = vsel %vm1048_vm14, %v1043_v13, %v1045_v21  ;;  %v1050_v24 = vsel %vm1048_vm14, %v1045_v21, %v1047_v20 }
 0x133   : > { %v1055_v25 = vsel %vm370_vm0, %v1049_v23, 0  ;;  %1307 = vmatmul.mubr.msk.bf16.vlgmr.msra.gmra.mrb[12].mxu1 %vm366_vm2, %v1305_v19  ;;  %1309 = vmatprep.subr.msk.bf16.mxu0 %vm370_vm0, %v1050_v24  ;;  %v1113_v24 = vld [vmem:[%s1760_s4] sm:$0x3] }
 0x134   : > { %1061 = vmatpush1.bf16.msra.mxu0 %v1055_v25  ;;  %1163 = vmatprep.mubr.bf16.mxu1 %v1485_v43 }
 0x137   : > { %1310 = vmatmul.mubr.msk.bf16.vlgmr.msra.gmra.mrb[16].mxu0 %vm366_vm2, %v1308_v26 }
 0x140   : > { %v1120_v25 = vpop.permute.xlu0 %1119 }
 0x142   : > { %v1107_v10 = vpop.permute.xlu1 %1106 }
 0x178   : > { %v411_v31 = vpop.f32.mrb[0].mxu0 }
 0x179   : > { %v413_v32 = vpop.f32.mrb[1].mxu0  ;;  %v471_v33 = vadd.f32 %v470_v27, %v411_v31 }
 0x17a   : > { %v415_v34 = vpop.f32.mrb[2].mxu0  ;;  %v473_v35 = vadd.f32 %v472_v28, %v413_v32 }
 0x17b   : > { %v416_v36 = vpop.f32.mrb[3].mxu0 }
 0x1ee   : > { %v668_v38 = vpop.f32.mrb[4].mxu1 }
 0x1ef   : > { %v670_v39 = vpop.f32.mrb[5].mxu1 }
 0x1f0   : > { %v672_v43 = vpop.f32.mrb[6].mxu1 }
 0x1f1   : > { %v673_v40 = vpop.f32.mrb[7].mxu1 }
 0x1f2   : > { %v580_v41 = vpop.f32.mrb[4].mxu0 }
 0x1f3   : > { %v587_v42 = vadd.f32 %v580_v41, %v471_v33  ;;  %v582_v44 = vpop.f32.mrb[5].mxu0 }
 0x1f4   : > { %v588_v45 = vadd.f32 %v582_v44, %v473_v35  ;;  %v584_v46 = vpop.f32.mrb[6].mxu0 }
 0x1f5   : > { %v675_v47 = vadd.f32 %v668_v38, %v587_v42  ;;  %v585_v48 = vpop.f32.mrb[7].mxu0 }
 0x1f6   : > { %v676_v49 = vadd.f32 %v670_v39, %v588_v45 }
 0x1fa   : > { %v749_v50 = vpop.f32.mrb[8].mxu0 }
 0x1fb   : > { %v756_v22 = vadd.f32 %v749_v50, %v675_v47  ;;  %v751_v51 = vpop.f32.mrb[9].mxu0 }
 0x1fc   : > { %v757_v52 = vadd.f32 %v751_v51, %v676_v49  ;;  %v753_v53 = vpop.f32.mrb[10].mxu0 }
 0x1fd   : > { %v754_v54 = vpop.f32.mrb[11].mxu0 }
 0x1fe   : > { %v837_v55 = vpop.f32.mrb[8].mxu1 }
 0x1ff   : > { %v844_v56 = vadd.f32 %v837_v55, %v756_v22  ;;  %v839_v57 = vpop.f32.mrb[9].mxu1 }
 0x200   : > { %v845_v58 = vadd.f32 %v839_v57, %v757_v52  ;;  %v841_v59 = vpop.f32.mrb[10].mxu1 }
 0x201   : > { %v842_v60 = vpop.f32.mrb[11].mxu1 }
 0x202   : > { %v925_v61 = vpop.f32.mrb[12].mxu0 }
 0x203   : > { %v932_v62 = vadd.f32 %v925_v61, %v844_v56  ;;  %v927_v63 = vpop.f32.mrb[13].mxu0 }
 0x204   : > { %v933_v0 = vadd.f32 %v927_v63, %v845_v58  ;;  %v929_v1 = vpop.f32.mrb[14].mxu0 }
 0x205   : > { %v930_v2 = vpop.f32.mrb[15].mxu0 }
 0x206   : > { %v1006_v3 = vpop.f32.mrb[12].mxu1 }
 0x207   : > { %v1013_v4 = vadd.f32 %v1006_v3, %v932_v62  ;;  %v1008_v5 = vpop.f32.mrb[13].mxu1 }
 0x208   : > { %v1014_v6 = vadd.f32 %v1008_v5, %v933_v0  ;;  %v1010_v7 = vpop.f32.mrb[14].mxu1 }
 0x209   : > { %v1011_v8 = vpop.f32.mrb[15].mxu1 }
 0x20a   : > { %v1094_v9 = vpop.f32.mrb[16].mxu0 }
 0x20b   : > { %v1101_v11 = vadd.f32 %v1094_v9, %v1013_v4  ;;  %v1096_v12 = vpop.f32.mrb[17].mxu0 }
 0x20c   : > { %v1102_v13 = vadd.f32 %v1096_v12, %v1014_v6  ;;  %v1098_v14 = vpop.f32.mrb[18].mxu0 }
 0x20d   : > { %v1109_v15 = vadd.f32 %v1107_v10, %v1101_v11  ;;  %v1099_v16 = vpop.f32.mrb[19].mxu0 }
 0x20e   : > { %v1110_v17 = vadd.f32 %v1107_v10, %v1102_v13 }
 0x20f   : > { %v1111_v18 = vmax.f32 %v1109_v15, 0.0 }
 0x210   : > { %v1112_v19 = vmax.f32 %v1110_v17, 0.0 }
 0x211   : > { %v1114_v20 = vpack.c.bf16 %v1111_v18, %v1111_v18 }
 0x212   : > { %v1115_v21 = vpack.c.bf16 %v1112_v19, %v1112_v19 }
 0x213   : > { %v1126_v23 = vsel %vm370_vm0, %v1114_v20, 0 }
 0x214   : > { %1311 = vmatprep.subr.msk.bf16.mxu1 %vm370_vm0, %v1115_v21 }
 0x215   : > { %1132 = vmatpush1.bf16.msra.mxu1 %v1126_v23 }
 0x218   : > { %1312 = vmatmul.mubr.msk.bf16.vlgmr.msra.gmra.mrb[16].mxu1 %vm366_vm2, %v1113_v24 }
 0x2eb   : > { %v1165_v26 = vpop.f32.mrb[16].mxu1 }
 0x2ec   : > { %v1167_v27 = vpop.f32.mrb[17].mxu1  ;;  %v1166_v28 = vadd.f32 %v1165_v26, %v1120_v25 }
 0x2ed   : > { %v1169_v29 = vpop.f32.mrb[18].mxu1  ;;  %v1168_v30 = vadd.f32 %v1167_v27, %v1120_v25 }
 0x2ee   : > { %v1170_v31 = vpop.f32.mrb[19].mxu1 }
 0x2ef   : > { %v1174_v32 = vcombine.low %v1166_v28, %v1168_v30 }
 0x2f1   : > { %1176 = vst [vmem:[%s272_s16] sm:$0xff] %v1174_v32 }
 0x2f2   : > { %1409 = shalt.err (!%p1406_p5)
}
 0x2f3   : > { %s1410_s11 = scalar_lea.hbm %s1709_s27, 128  ;;  %s1414_s14 = scalar_lea.hbm %s1762_s6, 256 }
 0x2f4   : > { %p1411_p6 = scmp.ne.s32.totalorder %s1709_s27, %s1410_s11  ;;  %p1415_p10 = scmp.lt.u32.totalorder %s1709_s27, %s1762_s6 }
 0x2f5   : > { %p1416_p11 = scmp.lt.u32.totalorder %s1414_s14, %s1410_s11  ;;  %p1418_p13 = scmp.lt.u32.totalorder %s1410_s11, %s1709_s27 }
 0x2f6   : > { %p1412_p7 = pnand %p1411_p6, %p1568_p4 }
 0x2f7   : > { %p1417_p12 = por %p1416_p11, %p1415_p10 }
 0x2f8   : > { %p1413_p9 = pneg %p1412_p7 }
 0x2f9   : > { %p1419_p0 = por %p1418_p13, %p1417_p12 }
 0x2fb   : > { %p1420_p1 = pnand %p1419_p0, %p1413_p9 }
 0x2fd   : > { %1423 = shalt.err (!%p1420_p1)
}
 0x2fe   : > { %1320 = dma.vmem_to_hbm [thread:$0]  (%p1568_p4), %s1711_s18, 128, %s1709_s27, %s1178_s17  }
 0x2ff PF: > { %p1326_p2 = scmp.ge.s32.totalorder %s1474_s26, 2  ;;  %s1206_s19 = sand.u32 1, %s1454_s21  }
 0x300   : > { %s1207_s20 = scalar_lea.sflag [#allocation3], %s1206_s19 }
 0x301   : > { %p1323_p3 = pnand %p1326_p2, %p1575_p8 }
 0x303   : > { %1449 = dma.done.wait (!%p1323_p3), %s1207_s20, 128  }
 0x304   : > { %1451 = vsyncadd (!%p1323_p3), %s1207_s20, 4294967168  ;;  %s19_s26 = sadd.s32 1, %s1474_s26   ;;  %s1765_s21 = smov %s1458_s22 }
 0x305   : > { %p16_p5 = scmp.ge.s32.totalorder %s19_s26, 4   ;;  %s1766_s22 = smov %s1462_s23 }
 0x306   : > { %s1767_s23 = smov %s1581_s10  ;;  %s1768_s24 = smov %s1470_s25 }
 0x307   : > { %s1769_s25 = smov %s1771_s29  ;;  %18 = sbr.rel (!%p16_p5) target bundleno = 4 (0x4), region = 90 }
 0x30e   :  { %1212 = vsyncpa [#allocation3], 1 }
 0x30f   :  { %1214 = vsyncpa [#allocation3 + $0x1], 1 }

</bundles_post_ra>
